<compile_context>
chip_gen: v7x
topology: tpu7x:2x2x1
jax: 0.10.0
libtpu: 0.0.40
codegen_flags: <defaults>
</compile_context>

<pallas_src>
import jax
import jax.numpy as jnp
from jax import lax
from jax.experimental import pallas as pl
from jax.experimental.pallas import tpu as pltpu


def _round_up(x, m):
    return ((x + m - 1) // m) * m


def _default_num_shards(batch):
    """>1 only helps on multi-TensorCore chips (v7x); safe fallback is 1."""
    n = 1
    try:
        dev = jax.devices()[0]
        n = int(getattr(dev, "num_cores", 1) or 1)
    except Exception:
        n = 1
    n = max(1, min(n, batch))
    while batch % n:
        n -= 1
    return n


def _pick_time_chunk(T, bbp, Ip, Gp, budget_bytes=8 * 1024 * 1024):
    """Largest divisor of T whose x-chunk (double-buffered) + xg-chunk fits
    the budget.  Lower the budget (~4 MiB) for v7x's 64 MiB VMEM if needed."""
    per_t = bbp * (2 * Ip + Gp) * 4
    tc = max(1, min(T, budget_bytes // max(per_t, 1)))
    while T % tc:
        tc -= 1
    return int(tc)


def lstm_kernel(x_ref, wih_ref, whh_ref, b_ref, wfc_ref, bfc_ref,
                out_ref, xg_ref, h_ref, c_ref):
    # x_ref:   (1, Tc, bbp, Ip)  time-chunk of this batch shard (time-major)
    # wih_ref: (Ip, Gp)          gate-permuted [i, f, o, g], H-padded
    # whh_ref: (Hp, Gp)
    # b_ref:   (1, Gp)           b_ih + b_hh
    # wfc_ref: (Hp, Op)          fc weight (lane-padded)
    # bfc_ref: (1, Op)
    # out_ref: (bbp, Op)         resident across the time-chunk axis
    # xg_ref:  (Tc, bbp, Gp)     scratch: input projection for this chunk
    # h_ref, c_ref: (bbp, Hp)    scratch: recurrent state carried across chunks
    Tc, bbp, Ip = x_ref.shape[1], x_ref.shape[2], x_ref.shape[3]
    Hp, Gp = whh_ref.shape
    tc = pl.program_id(1)

    @pl.when(tc == 0)
    def _init():
        h_ref[...] = jnp.zeros_like(h_ref)
        c_ref[...] = jnp.zeros_like(c_ref)

    # Input projection for every timestep of this chunk: one big MXU matmul.
    x2 = x_ref[0].reshape(Tc * bbp, Ip)
    xg = jnp.dot(x2, wih_ref[...], preferred_element_type=jnp.float32)
    xg_ref[...] = (xg + b_ref[...]).reshape(Tc, bbp, Gp)

    # Hoist the resident recurrent weight out of the time loop.
    whh = whh_ref[...]
    h0 = h_ref[...]
    c0 = c_ref[...]

    def step(t, carry):
        h, c = carry
        gates = xg_ref[t] + jnp.dot(h.astype(whh.dtype), whh,
                                    preferred_element_type=jnp.float32)
        # Gate layout (permuted in wrapper): [i, f, o, g] -> one sigmoid pass
        # over the leading 3*Hp lanes, one tanh over the trailing Hp.
        ifo = jax.nn.sigmoid(gates[:, :3 * Hp])
        g_g = jnp.tanh(gates[:, 3 * Hp:])
        i_g = ifo[:, :Hp]
        f_g = ifo[:, Hp:2 * Hp]
        o_g = ifo[:, 2 * Hp:]
        c_new = f_g * c + i_g * g_g
        h_new = o_g * jnp.tanh(c_new)
        return (h_new, c_new)

    # Serial recurrence over this chunk; bounded unroll keeps the vreg file
    # and code size sane for long sequences while giving LLO visibility.
    h_last, c_last = lax.fori_loop(0, Tc, step, (h0, c0), unroll=min(8, Tc))
    h_ref[...] = h_last
    c_ref[...] = c_last

    @pl.when(tc == pl.num_programs(1) - 1)
    def _finalize():
        out = (jnp.dot(h_last, wfc_ref[...], preferred_element_type=jnp.float32)
               + bfc_ref[...])
        out_ref[...] = out.astype(out_ref.dtype)


def simple_lstm_forward(x, w_ih, w_hh, b_ih, b_hh, w_fc, b_fc,
                        batch_shards=None, time_chunk=None,
                        param_dtype=jnp.float32):
    """x: (B, T, I) float32.  Returns (B, O) float32.

    PyTorch semantics: single-layer nn.LSTM (batch_first=True), zero initial
    state, nn.Linear applied to the last timestep's hidden state.
    """
    B, T, I = x.shape
    H = w_hh.shape[1]
    O = w_fc.shape[0]

    nb = _default_num_shards(B) if batch_shards is None else int(batch_shards)
    assert B % nb == 0, "batch_shards must divide the batch size"
    bb = B // nb
    bbp = max(8, _round_up(bb, 8))           # sublane-aligned per-shard batch
    Ip = max(128, _round_up(I, 128))         # lane-aligned input dim
    Hp = max(128, _round_up(H, 128))         # lane-aligned hidden dim
    Gp = 4 * Hp
    Op = max(128, _round_up(O, 128))         # lane-dense fc output

    Tc = _pick_time_chunk(T, bbp, Ip, Gp) if time_chunk is None else int(time_chunk)
    assert T % Tc == 0, "time_chunk must divide T"
    n_chunks = T // Tc

    f32 = jnp.float32

    # --- Weight prep: permute PyTorch gate order [i,f,g,o] -> [i,f,o,g] and
    # zero-pad each gate block from H to Hp (exact for LSTM: padded gates give
    # c = h = 0 forever, and padded W_hh/W_fc rows are zero).
    perm_src = (0, 1, 3, 2)   # dest slot k takes source gate perm_src[k]
    w_ih_t = jnp.zeros((Ip, Gp), param_dtype)
    w_hh_t = jnp.zeros((Hp, Gp), param_dtype)
    b_vec = jnp.zeros((1, Gp), f32)
    b_sum = (b_ih + b_hh).astype(f32)
    for k, s in enumerate(perm_src):
        w_ih_t = w_ih_t.at[:I, k * Hp:k * Hp + H].set(
            jnp.transpose(w_ih[s * H:(s + 1) * H, :]).astype(param_dtype))
        w_hh_t = w_hh_t.at[:H, k * Hp:k * Hp + H].set(
            jnp.transpose(w_hh[s * H:(s + 1) * H, :]).astype(param_dtype))
        b_vec = b_vec.at[0, k * Hp:k * Hp + H].set(b_sum[s * H:(s + 1) * H])

    w_fc_t = jnp.zeros((Hp, Op), f32).at[:H, :O].set(jnp.transpose(w_fc).astype(f32))
    b_fc_p = jnp.zeros((1, Op), f32).at[0, :O].set(b_fc.astype(f32))

    # --- Input prep: batch/feature zero-pad + time-major reorder in ONE fused
    # expression (single XLA copy, no separate transpose pass over HBM).
    x_pad = jnp.zeros((nb, bbp, T, Ip), x.dtype).at[:, :bb, :, :I].set(
        x.reshape(nb, bb, T, I))
    x_tm = jnp.transpose(x_pad, (0, 2, 1, 3)).astype(param_dtype)  # (nb,T,bbp,Ip)

    grid_spec = pltpu.PrefetchScalarGridSpec(
        num_scalar_prefetch=0,
        grid=(nb, n_chunks),
        in_specs=[
            pl.BlockSpec((1, Tc, bbp, Ip), lambda bi, tc: (bi, tc, 0, 0)),  # x chunk
            pl.BlockSpec((Ip, Gp), lambda bi, tc: (0, 0)),                  # W_ih^T
            pl.BlockSpec((Hp, Gp), lambda bi, tc: (0, 0)),                  # W_hh^T
            pl.BlockSpec((1, Gp), lambda bi, tc: (0, 0)),                   # bias
            pl.BlockSpec((Hp, Op), lambda bi, tc: (0, 0)),                  # W_fc^T
            pl.BlockSpec((1, Op), lambda bi, tc: (0, 0)),                   # b_fc
        ],
        out_specs=pl.BlockSpec((bbp, Op), lambda bi, tc: (bi, 0)),
        scratch_shapes=[
            pltpu.VMEM((Tc, bbp, Gp), f32),   # per-chunk input projection
            pltpu.VMEM((bbp, Hp), f32),       # h carried across chunks
            pltpu.VMEM((bbp, Hp), f32),       # c carried across chunks
        ],
    )

    # Explicit VMEM limit sized from the actual footprint (+50% headroom),
    # capped well under physical VMEM on any generation.
    wbytes = jnp.dtype(param_dtype).itemsize
    xbytes = jnp.dtype(x_tm.dtype).itemsize
    est = (2 * Tc * bbp * Ip * xbytes            # x chunk, double-buffered
           + 2 * (Ip * Gp + Hp * Gp) * wbytes    # resident recurrent weights
           + 2 * (Gp + Hp * Op + Op) * 4         # bias, fc weights
           + Tc * bbp * Gp * 4                   # xg scratch
           + 2 * bbp * Hp * 4                    # h, c scratch
           + 2 * bbp * Op * 4)                   # output block
    vmem_limit = int(min(max(est * 3 // 2, 32 * 1024 * 1024), 96 * 1024 * 1024))

    out_pad = pl.pallas_call(
        lstm_kernel,
        out_shape=jax.ShapeDtypeStruct((nb * bbp, Op), f32),
        grid_spec=grid_spec,
        compiler_params=pltpu.CompilerParams(
            dimension_semantics=("parallel", "arbitrary"),
            vmem_limit_bytes=vmem_limit),
    )(x_tm, w_ih_t, w_hh_t, b_vec, w_fc_t, b_fc_p)

    # Drop batch/output padding.
    out = out_pad.reshape(nb, bbp, Op)[:, :bb, :O].reshape(B, O)
    return out


def simple_lstm_ref(x, w_ih, w_hh, b_ih, b_hh, w_fc, b_fc):
    """Pure-JAX reference (PyTorch nn.LSTM semantics, single layer)."""
    B, T, I = x.shape
    H = w_hh.shape[1]

    def step(carry, x_t):
        h, c = carry
        gates = x_t @ w_ih.T + h @ w_hh.T + b_ih + b_hh
        i_g = jax.nn.sigmoid(gates[:, 0 * H:1 * H])
        f_g = jax.nn.sigmoid(gates[:, 1 * H:2 * H])
        g_g = jnp.tanh(gates[:, 2 * H:3 * H])
        o_g = jax.nn.sigmoid(gates[:, 3 * H:4 * H])
        c_new = f_g * c + i_g * g_g
        h_new = o_g * jnp.tanh(c_new)
        return (h_new, c_new), h_new

    h0 = jnp.zeros((B, H), jnp.float32)
    c0 = jnp.zeros((B, H), jnp.float32)
    (h_last, _), _ = lax.scan(step, (h0, c0), jnp.transpose(x, (1, 0, 2)))
    return h_last @ w_fc.T + b_fc


if __name__ == "__main__":
    # Small, deterministic configuration.
    B, T, I, H, O = 2, 8, 16, 32, 8

    key = jax.random.PRNGKey(0)
    kx, k1, k2, k3, k4, k5, k6 = jax.random.split(key, 7)

    x = jax.random.normal(kx, (B, T, I), jnp.float32)

    scale = 0.1
    w_ih = scale * jax.random.normal(k1, (4 * H, I), jnp.float32)   # (4H, I)
    w_hh = scale * jax.random.normal(k2, (4 * H, H), jnp.float32)   # (4H, H)
    b_ih = scale * jax.random.normal(k3, (4 * H,), jnp.float32)
    b_hh = scale * jax.random.normal(k4, (4 * H,), jnp.float32)
    w_fc = scale * jax.random.normal(k5, (O, H), jnp.float32)       # (O, H)
    b_fc = scale * jax.random.normal(k6, (O,), jnp.float32)

    out = simple_lstm_forward(x, w_ih, w_hh, b_ih, b_hh, w_fc, b_fc)
    out = jax.block_until_ready(out)

    ref = simple_lstm_ref(x, w_ih, w_hh, b_ih, b_hh, w_fc, b_fc)
    assert out.shape == (B, O)
    assert jnp.allclose(out, ref, atol=1e-4, rtol=1e-4), (
        f"max abs err = {jnp.max(jnp.abs(out - ref))}")

    print("KERNEL_OK")
</pallas_src>

<mosaic_0001>
module attributes {stable_mosaic.version = 11 : i64} {
  func.func @lstm_kernel(%arg0: i32, %arg1: i32, %arg2: memref<1x8x8x128xf32, #tpu.memory_space<vmem>>, %arg3: memref<128x512xf32, #tpu.memory_space<vmem>>, %arg4: memref<128x512xf32, #tpu.memory_space<vmem>>, %arg5: memref<1x512xf32, #tpu.memory_space<vmem>>, %arg6: memref<128x128xf32, #tpu.memory_space<vmem>>, %arg7: memref<1x128xf32, #tpu.memory_space<vmem>>, %arg8: memref<8x128xf32, #tpu.memory_space<vmem>>, %arg9: memref<8x8x512xf32, #tpu.memory_space<vmem>>, %arg10: memref<8x128xf32, #tpu.memory_space<vmem>>, %arg11: memref<8x128xf32, #tpu.memory_space<vmem>>) attributes {dimension_semantics = [#tpu.dimension_semantics<parallel>, #tpu.dimension_semantics<arbitrary>], iteration_bounds = array<i64: 1, 1>, scalar_prefetch = 0 : i64, scratch_operands = 3 : i64, tpu.core_type = #tpu.core_type<tc>, window_params = [{transform_indices = @transform_0, window_bounds = array<i64: 1, 8, 8, 128>}, {pipeline_mode = #tpu.pipeline_mode<synchronous>, transform_indices = @transform_1, window_bounds = array<i64: 128, 512>}, {pipeline_mode = #tpu.pipeline_mode<synchronous>, transform_indices = @transform_2, window_bounds = array<i64: 128, 512>}, {pipeline_mode = #tpu.pipeline_mode<synchronous>, transform_indices = @transform_3, window_bounds = array<i64: 1, 512>}, {pipeline_mode = #tpu.pipeline_mode<synchronous>, transform_indices = @transform_4, window_bounds = array<i64: 128, 128>}, {pipeline_mode = #tpu.pipeline_mode<synchronous>, transform_indices = @transform_5, window_bounds = array<i64: 1, 128>}, {transform_indices = @transform_6, window_bounds = array<i64: 8, 128>}]} {
    %c0_i32 = arith.constant 0 : i32
    %0 = arith.cmpi eq, %arg1, %c0_i32 : i32
    %1 = arith.extui %0 : i1 to i32
    %c0_i32_0 = arith.constant 0 : i32
    %2 = arith.cmpi ne, %1, %c0_i32_0 : i32
    scf.if %2 {
      %cst_56 = arith.constant 0.000000e+00 : f32
      %189 = vector.broadcast %cst_56 : f32 to vector<8x128xf32>
      %c0_57 = arith.constant 0 : index
      %c0_58 = arith.constant 0 : index
      %190 = vector.load %arg10[%c0_57, %c0_58] : memref<8x128xf32, #tpu.memory_space<vmem>>, vector<8x128xf32>
      tpu.vector_store %arg10[%c0_57, %c0_58], %189 {strides = array<i32>} : memref<8x128xf32, #tpu.memory_space<vmem>>, vector<8x128xf32>,
      %cst_59 = arith.constant 0.000000e+00 : f32
      %191 = vector.broadcast %cst_59 : f32 to vector<8x128xf32>
      %c0_60 = arith.constant 0 : index
      %c0_61 = arith.constant 0 : index
      %192 = vector.load %arg11[%c0_60, %c0_61] : memref<8x128xf32, #tpu.memory_space<vmem>>, vector<8x128xf32>
      tpu.vector_store %arg11[%c0_60, %c0_61], %191 {strides = array<i32>} : memref<8x128xf32, #tpu.memory_space<vmem>>, vector<8x128xf32>,
    } else {
    }
    %c0 = arith.constant 0 : index
    %c0_1 = arith.constant 0 : index
    %c0_2 = arith.constant 0 : index
    %c0_3 = arith.constant 0 : index
    %3 = vector.load %arg2[%c0, %c0_1, %c0_2, %c0_3] : memref<1x8x8x128xf32, #tpu.memory_space<vmem>>, vector<1x8x8x128xf32>
    %4 = vector.shape_cast %3 : vector<1x8x8x128xf32> to vector<8x8x128xf32>
    %5 = vector.shape_cast %4 : vector<8x8x128xf32> to vector<64x128xf32>
    %c0_4 = arith.constant 0 : index
    %c0_5 = arith.constant 0 : index
    %6 = vector.load %arg3[%c0_4, %c0_5] : memref<128x512xf32, #tpu.memory_space<vmem>>, vector<128x512xf32>
    %cst = arith.constant dense<0.000000e+00> : vector<64x512xf32>
    %7 = tpu.matmul %5, %6, %cst {dimension_numbers = #tpu.dot_dimension_numbers<[1], [0], [0], [1], [0, 0, 1, 1], [], []>} : vector<64x128xf32>, vector<128x512xf32>, vector<64x512xf32> -> vector<64x512xf32>
    %c0_6 = arith.constant 0 : index
    %c0_7 = arith.constant 0 : index
    %8 = vector.load %arg5[%c0_6, %c0_7] : memref<1x512xf32, #tpu.memory_space<vmem>>, vector<1x512xf32>
    %9 = vector.broadcast %8 : vector<1x512xf32> to vector<64x512xf32>
    %10 = arith.addf %7, %9 : vector<64x512xf32>
    %11 = vector.shape_cast %10 : vector<64x512xf32> to vector<8x8x512xf32>
    %c0_8 = arith.constant 0 : index
    %c0_9 = arith.constant 0 : index
    %c0_10 = arith.constant 0 : index
    %12 = vector.load %arg9[%c0_8, %c0_9, %c0_10] : memref<8x8x512xf32, #tpu.memory_space<vmem>>, vector<8x8x512xf32>
    tpu.vector_store %arg9[%c0_8, %c0_9, %c0_10], %11 {strides = array<i32>} : memref<8x8x512xf32, #tpu.memory_space<vmem>>, vector<8x8x512xf32>,
    %c0_11 = arith.constant 0 : index
    %c0_12 = arith.constant 0 : index
    %13 = vector.load %arg4[%c0_11, %c0_12] : memref<128x512xf32, #tpu.memory_space<vmem>>, vector<128x512xf32>
    %c0_13 = arith.constant 0 : index
    %c0_14 = arith.constant 0 : index
    %14 = vector.load %arg10[%c0_13, %c0_14] : memref<8x128xf32, #tpu.memory_space<vmem>>, vector<8x128xf32>
    %c0_15 = arith.constant 0 : index
    %c0_16 = arith.constant 0 : index
    %15 = vector.load %arg11[%c0_15, %c0_16] : memref<8x128xf32, #tpu.memory_space<vmem>>, vector<8x128xf32>
    %c0_i32_17 = arith.constant 0 : i32
    %16 = arith.index_cast %c0_i32_17 : i32 to index
    %c0_18 = arith.constant 0 : index
    %c0_19 = arith.constant 0 : index
    %17 = vector.load %arg9[%16, %c0_18, %c0_19] : memref<8x8x512xf32, #tpu.memory_space<vmem>>, vector<1x8x512xf32>
    %18 = vector.shape_cast %17 : vector<1x8x512xf32> to vector<8x512xf32>
    %cst_20 = arith.constant dense<0.000000e+00> : vector<8x512xf32>
    %19 = tpu.matmul %14, %13, %cst_20 {dimension_numbers = #tpu.dot_dimension_numbers<[1], [0], [0], [1], [0, 0, 1, 1], [], []>} : vector<8x128xf32>, vector<128x512xf32>, vector<8x512xf32> -> vector<8x512xf32>
    %20 = arith.addf %18, %19 : vector<8x512xf32>
    %21 = vector.extract_strided_slice %20 {offsets = [0, 0], sizes = [8, 384], strides = [1, 1]} : vector<8x512xf32> to vector<8x384xf32>
    %22 = arith.negf %21 : vector<8x384xf32>
    %23 = math.exp %22 : vector<8x384xf32>
    %cst_21 = arith.constant 1.000000e+00 : f32
    %24 = vector.broadcast %cst_21 : f32 to vector<8x384xf32>
    %25 = arith.addf %24, %23 : vector<8x384xf32>
    %26 = arith.divf %24, %25 : vector<8x384xf32>
    %27 = vector.extract_strided_slice %20 {offsets = [0, 384], sizes = [8, 128], strides = [1, 1]} : vector<8x512xf32> to vector<8x128xf32>
    %28 = math.tanh %27 : vector<8x128xf32>
    %29 = vector.extract_strided_slice %26 {offsets = [0, 0], sizes = [8, 128], strides = [1, 1]} : vector<8x384xf32> to vector<8x128xf32>
    %30 = vector.extract_strided_slice %26 {offsets = [0, 128], sizes = [8, 128], strides = [1, 1]} : vector<8x384xf32> to vector<8x128xf32>
    %31 = vector.extract_strided_slice %26 {offsets = [0, 256], sizes = [8, 128], strides = [1, 1]} : vector<8x384xf32> to vector<8x128xf32>
    %32 = arith.mulf %30, %15 : vector<8x128xf32>
    %33 = arith.mulf %29, %28 : vector<8x128xf32>
    %34 = arith.addf %32, %33 : vector<8x128xf32>
    %35 = math.tanh %34 : vector<8x128xf32>
    %36 = arith.mulf %31, %35 : vector<8x128xf32>
    %c1_i32 = arith.constant 1 : i32
    %37 = arith.index_cast %c1_i32 : i32 to index
    %c0_22 = arith.constant 0 : index
    %c0_23 = arith.constant 0 : index
    %38 = vector.load %arg9[%37, %c0_22, %c0_23] : memref<8x8x512xf32, #tpu.memory_space<vmem>>, vector<1x8x512xf32>
    %39 = vector.shape_cast %38 : vector<1x8x512xf32> to vector<8x512xf32>
    %cst_24 = arith.constant dense<0.000000e+00> : vector<8x512xf32>
    %40 = tpu.matmul %36, %13, %cst_24 {dimension_numbers = #tpu.dot_dimension_numbers<[1], [0], [0], [1], [0, 0, 1, 1], [], []>} : vector<8x128xf32>, vector<128x512xf32>, vector<8x512xf32> -> vector<8x512xf32>
    %41 = arith.addf %39, %40 : vector<8x512xf32>
    %42 = vector.extract_strided_slice %41 {offsets = [0, 0], sizes = [8, 384], strides = [1, 1]} : vector<8x512xf32> to vector<8x384xf32>
    %43 = arith.negf %42 : vector<8x384xf32>
    %44 = math.exp %43 : vector<8x384xf32>
    %cst_25 = arith.constant 1.000000e+00 : f32
    %45 = vector.broadcast %cst_25 : f32 to vector<8x384xf32>
    %46 = arith.addf %45, %44 : vector<8x384xf32>
    %47 = arith.divf %45, %46 : vector<8x384xf32>
    %48 = vector.extract_strided_slice %41 {offsets = [0, 384], sizes = [8, 128], strides = [1, 1]} : vector<8x512xf32> to vector<8x128xf32>
    %49 = math.tanh %48 : vector<8x128xf32>
    %50 = vector.extract_strided_slice %47 {offsets = [0, 0], sizes = [8, 128], strides = [1, 1]} : vector<8x384xf32> to vector<8x128xf32>
    %51 = vector.extract_strided_slice %47 {offsets = [0, 128], sizes = [8, 128], strides = [1, 1]} : vector<8x384xf32> to vector<8x128xf32>
    %52 = vector.extract_strided_slice %47 {offsets = [0, 256], sizes = [8, 128], strides = [1, 1]} : vector<8x384xf32> to vector<8x128xf32>
    %53 = arith.mulf %51, %34 : vector<8x128xf32>
    %54 = arith.mulf %50, %49 : vector<8x128xf32>
    %55 = arith.addf %53, %54 : vector<8x128xf32>
    %56 = math.tanh %55 : vector<8x128xf32>
    %57 = arith.mulf %52, %56 : vector<8x128xf32>
    %c2_i32 = arith.constant 2 : i32
    %58 = arith.index_cast %c2_i32 : i32 to index
    %c0_26 = arith.constant 0 : index
    %c0_27 = arith.constant 0 : index
    %59 = vector.load %arg9[%58, %c0_26, %c0_27] : memref<8x8x512xf32, #tpu.memory_space<vmem>>, vector<1x8x512xf32>
    %60 = vector.shape_cast %59 : vector<1x8x512xf32> to vector<8x512xf32>
    %cst_28 = arith.constant dense<0.000000e+00> : vector<8x512xf32>
    %61 = tpu.matmul %57, %13, %cst_28 {dimension_numbers = #tpu.dot_dimension_numbers<[1], [0], [0], [1], [0, 0, 1, 1], [], []>} : vector<8x128xf32>, vector<128x512xf32>, vector<8x512xf32> -> vector<8x512xf32>
    %62 = arith.addf %60, %61 : vector<8x512xf32>
    %63 = vector.extract_strided_slice %62 {offsets = [0, 0], sizes = [8, 384], strides = [1, 1]} : vector<8x512xf32> to vector<8x384xf32>
    %64 = arith.negf %63 : vector<8x384xf32>
    %65 = math.exp %64 : vector<8x384xf32>
    %cst_29 = arith.constant 1.000000e+00 : f32
    %66 = vector.broadcast %cst_29 : f32 to vector<8x384xf32>
    %67 = arith.addf %66, %65 : vector<8x384xf32>
    %68 = arith.divf %66, %67 : vector<8x384xf32>
    %69 = vector.extract_strided_slice %62 {offsets = [0, 384], sizes = [8, 128], strides = [1, 1]} : vector<8x512xf32> to vector<8x128xf32>
    %70 = math.tanh %69 : vector<8x128xf32>
    %71 = vector.extract_strided_slice %68 {offsets = [0, 0], sizes = [8, 128], strides = [1, 1]} : vector<8x384xf32> to vector<8x128xf32>
    %72 = vector.extract_strided_slice %68 {offsets = [0, 128], sizes = [8, 128], strides = [1, 1]} : vector<8x384xf32> to vector<8x128xf32>
    %73 = vector.extract_strided_slice %68 {offsets = [0, 256], sizes = [8, 128], strides = [1, 1]} : vector<8x384xf32> to vector<8x128xf32>
    %74 = arith.mulf %72, %55 : vector<8x128xf32>
    %75 = arith.mulf %71, %70 : vector<8x128xf32>
    %76 = arith.addf %74, %75 : vector<8x128xf32>
    %77 = math.tanh %76 : vector<8x128xf32>
    %78 = arith.mulf %73, %77 : vector<8x128xf32>
    %c3_i32 = arith.constant 3 : i32
    %79 = arith.index_cast %c3_i32 : i32 to index
    %c0_30 = arith.constant 0 : index
    %c0_31 = arith.constant 0 : index
    %80 = vector.load %arg9[%79, %c0_30, %c0_31] : memref<8x8x512xf32, #tpu.memory_space<vmem>>, vector<1x8x512xf32>
    %81 = vector.shape_cast %80 : vector<1x8x512xf32> to vector<8x512xf32>
    %cst_32 = arith.constant dense<0.000000e+00> : vector<8x512xf32>
    %82 = tpu.matmul %78, %13, %cst_32 {dimension_numbers = #tpu.dot_dimension_numbers<[1], [0], [0], [1], [0, 0, 1, 1], [], []>} : vector<8x128xf32>, vector<128x512xf32>, vector<8x512xf32> -> vector<8x512xf32>
    %83 = arith.addf %81, %82 : vector<8x512xf32>
    %84 = vector.extract_strided_slice %83 {offsets = [0, 0], sizes = [8, 384], strides = [1, 1]} : vector<8x512xf32> to vector<8x384xf32>
    %85 = arith.negf %84 : vector<8x384xf32>
    %86 = math.exp %85 : vector<8x384xf32>
    %cst_33 = arith.constant 1.000000e+00 : f32
    %87 = vector.broadcast %cst_33 : f32 to vector<8x384xf32>
    %88 = arith.addf %87, %86 : vector<8x384xf32>
    %89 = arith.divf %87, %88 : vector<8x384xf32>
    %90 = vector.extract_strided_slice %83 {offsets = [0, 384], sizes = [8, 128], strides = [1, 1]} : vector<8x512xf32> to vector<8x128xf32>
    %91 = math.tanh %90 : vector<8x128xf32>
    %92 = vector.extract_strided_slice %89 {offsets = [0, 0], sizes = [8, 128], strides = [1, 1]} : vector<8x384xf32> to vector<8x128xf32>
    %93 = vector.extract_strided_slice %89 {offsets = [0, 128], sizes = [8, 128], strides = [1, 1]} : vector<8x384xf32> to vector<8x128xf32>
    %94 = vector.extract_strided_slice %89 {offsets = [0, 256], sizes = [8, 128], strides = [1, 1]} : vector<8x384xf32> to vector<8x128xf32>
    %95 = arith.mulf %93, %76 : vector<8x128xf32>
    %96 = arith.mulf %92, %91 : vector<8x128xf32>
    %97 = arith.addf %95, %96 : vector<8x128xf32>
    %98 = math.tanh %97 : vector<8x128xf32>
    %99 = arith.mulf %94, %98 : vector<8x128xf32>
    %c4_i32 = arith.constant 4 : i32
    %100 = arith.index_cast %c4_i32 : i32 to index
    %c0_34 = arith.constant 0 : index
    %c0_35 = arith.constant 0 : index
    %101 = vector.load %arg9[%100, %c0_34, %c0_35] : memref<8x8x512xf32, #tpu.memory_space<vmem>>, vector<1x8x512xf32>
    %102 = vector.shape_cast %101 : vector<1x8x512xf32> to vector<8x512xf32>
    %cst_36 = arith.constant dense<0.000000e+00> : vector<8x512xf32>
    %103 = tpu.matmul %99, %13, %cst_36 {dimension_numbers = #tpu.dot_dimension_numbers<[1], [0], [0], [1], [0, 0, 1, 1], [], []>} : vector<8x128xf32>, vector<128x512xf32>, vector<8x512xf32> -> vector<8x512xf32>
    %104 = arith.addf %102, %103 : vector<8x512xf32>
    %105 = vector.extract_strided_slice %104 {offsets = [0, 0], sizes = [8, 384], strides = [1, 1]} : vector<8x512xf32> to vector<8x384xf32>
    %106 = arith.negf %105 : vector<8x384xf32>
    %107 = math.exp %106 : vector<8x384xf32>
    %cst_37 = arith.constant 1.000000e+00 : f32
    %108 = vector.broadcast %cst_37 : f32 to vector<8x384xf32>
    %109 = arith.addf %108, %107 : vector<8x384xf32>
    %110 = arith.divf %108, %109 : vector<8x384xf32>
    %111 = vector.extract_strided_slice %104 {offsets = [0, 384], sizes = [8, 128], strides = [1, 1]} : vector<8x512xf32> to vector<8x128xf32>
    %112 = math.tanh %111 : vector<8x128xf32>
    %113 = vector.extract_strided_slice %110 {offsets = [0, 0], sizes = [8, 128], strides = [1, 1]} : vector<8x384xf32> to vector<8x128xf32>
    %114 = vector.extract_strided_slice %110 {offsets = [0, 128], sizes = [8, 128], strides = [1, 1]} : vector<8x384xf32> to vector<8x128xf32>
    %115 = vector.extract_strided_slice %110 {offsets = [0, 256], sizes = [8, 128], strides = [1, 1]} : vector<8x384xf32> to vector<8x128xf32>
    %116 = arith.mulf %114, %97 : vector<8x128xf32>
    %117 = arith.mulf %113, %112 : vector<8x128xf32>
    %118 = arith.addf %116, %117 : vector<8x128xf32>
    %119 = math.tanh %118 : vector<8x128xf32>
    %120 = arith.mulf %115, %119 : vector<8x128xf32>
    %c5_i32 = arith.constant 5 : i32
    %121 = arith.index_cast %c5_i32 : i32 to index
    %c0_38 = arith.constant 0 : index
    %c0_39 = arith.constant 0 : index
    %122 = vector.load %arg9[%121, %c0_38, %c0_39] : memref<8x8x512xf32, #tpu.memory_space<vmem>>, vector<1x8x512xf32>
    %123 = vector.shape_cast %122 : vector<1x8x512xf32> to vector<8x512xf32>
    %cst_40 = arith.constant dense<0.000000e+00> : vector<8x512xf32>
    %124 = tpu.matmul %120, %13, %cst_40 {dimension_numbers = #tpu.dot_dimension_numbers<[1], [0], [0], [1], [0, 0, 1, 1], [], []>} : vector<8x128xf32>, vector<128x512xf32>, vector<8x512xf32> -> vector<8x512xf32>
    %125 = arith.addf %123, %124 : vector<8x512xf32>
    %126 = vector.extract_strided_slice %125 {offsets = [0, 0], sizes = [8, 384], strides = [1, 1]} : vector<8x512xf32> to vector<8x384xf32>
    %127 = arith.negf %126 : vector<8x384xf32>
    %128 = math.exp %127 : vector<8x384xf32>
    %cst_41 = arith.constant 1.000000e+00 : f32
    %129 = vector.broadcast %cst_41 : f32 to vector<8x384xf32>
    %130 = arith.addf %129, %128 : vector<8x384xf32>
    %131 = arith.divf %129, %130 : vector<8x384xf32>
    %132 = vector.extract_strided_slice %125 {offsets = [0, 384], sizes = [8, 128], strides = [1, 1]} : vector<8x512xf32> to vector<8x128xf32>
    %133 = math.tanh %132 : vector<8x128xf32>
    %134 = vector.extract_strided_slice %131 {offsets = [0, 0], sizes = [8, 128], strides = [1, 1]} : vector<8x384xf32> to vector<8x128xf32>
    %135 = vector.extract_strided_slice %131 {offsets = [0, 128], sizes = [8, 128], strides = [1, 1]} : vector<8x384xf32> to vector<8x128xf32>
    %136 = vector.extract_strided_slice %131 {offsets = [0, 256], sizes = [8, 128], strides = [1, 1]} : vector<8x384xf32> to vector<8x128xf32>
    %137 = arith.mulf %135, %118 : vector<8x128xf32>
    %138 = arith.mulf %134, %133 : vector<8x128xf32>
    %139 = arith.addf %137, %138 : vector<8x128xf32>
    %140 = math.tanh %139 : vector<8x128xf32>
    %141 = arith.mulf %136, %140 : vector<8x128xf32>
    %c6_i32 = arith.constant 6 : i32
    %142 = arith.index_cast %c6_i32 : i32 to index
    %c0_42 = arith.constant 0 : index
    %c0_43 = arith.constant 0 : index
    %143 = vector.load %arg9[%142, %c0_42, %c0_43] : memref<8x8x512xf32, #tpu.memory_space<vmem>>, vector<1x8x512xf32>
    %144 = vector.shape_cast %143 : vector<1x8x512xf32> to vector<8x512xf32>
    %cst_44 = arith.constant dense<0.000000e+00> : vector<8x512xf32>
    %145 = tpu.matmul %141, %13, %cst_44 {dimension_numbers = #tpu.dot_dimension_numbers<[1], [0], [0], [1], [0, 0, 1, 1], [], []>} : vector<8x128xf32>, vector<128x512xf32>, vector<8x512xf32> -> vector<8x512xf32>
    %146 = arith.addf %144, %145 : vector<8x512xf32>
    %147 = vector.extract_strided_slice %146 {offsets = [0, 0], sizes = [8, 384], strides = [1, 1]} : vector<8x512xf32> to vector<8x384xf32>
    %148 = arith.negf %147 : vector<8x384xf32>
    %149 = math.exp %148 : vector<8x384xf32>
    %cst_45 = arith.constant 1.000000e+00 : f32
    %150 = vector.broadcast %cst_45 : f32 to vector<8x384xf32>
    %151 = arith.addf %150, %149 : vector<8x384xf32>
    %152 = arith.divf %150, %151 : vector<8x384xf32>
    %153 = vector.extract_strided_slice %146 {offsets = [0, 384], sizes = [8, 128], strides = [1, 1]} : vector<8x512xf32> to vector<8x128xf32>
    %154 = math.tanh %153 : vector<8x128xf32>
    %155 = vector.extract_strided_slice %152 {offsets = [0, 0], sizes = [8, 128], strides = [1, 1]} : vector<8x384xf32> to vector<8x128xf32>
    %156 = vector.extract_strided_slice %152 {offsets = [0, 128], sizes = [8, 128], strides = [1, 1]} : vector<8x384xf32> to vector<8x128xf32>
    %157 = vector.extract_strided_slice %152 {offsets = [0, 256], sizes = [8, 128], strides = [1, 1]} : vector<8x384xf32> to vector<8x128xf32>
    %158 = arith.mulf %156, %139 : vector<8x128xf32>
    %159 = arith.mulf %155, %154 : vector<8x128xf32>
    %160 = arith.addf %158, %159 : vector<8x128xf32>
    %161 = math.tanh %160 : vector<8x128xf32>
    %162 = arith.mulf %157, %161 : vector<8x128xf32>
    %c7_i32 = arith.constant 7 : i32
    %163 = arith.index_cast %c7_i32 : i32 to index
    %c0_46 = arith.constant 0 : index
    %c0_47 = arith.constant 0 : index
    %164 = vector.load %arg9[%163, %c0_46, %c0_47] : memref<8x8x512xf32, #tpu.memory_space<vmem>>, vector<1x8x512xf32>
    %165 = vector.shape_cast %164 : vector<1x8x512xf32> to vector<8x512xf32>
    %cst_48 = arith.constant dense<0.000000e+00> : vector<8x512xf32>
    %166 = tpu.matmul %162, %13, %cst_48 {dimension_numbers = #tpu.dot_dimension_numbers<[1], [0], [0], [1], [0, 0, 1, 1], [], []>} : vector<8x128xf32>, vector<128x512xf32>, vector<8x512xf32> -> vector<8x512xf32>
    %167 = arith.addf %165, %166 : vector<8x512xf32>
    %168 = vector.extract_strided_slice %167 {offsets = [0, 0], sizes = [8, 384], strides = [1, 1]} : vector<8x512xf32> to vector<8x384xf32>
    %169 = arith.negf %168 : vector<8x384xf32>
    %170 = math.exp %169 : vector<8x384xf32>
    %cst_49 = arith.constant 1.000000e+00 : f32
    %171 = vector.broadcast %cst_49 : f32 to vector<8x384xf32>
    %172 = arith.addf %171, %170 : vector<8x384xf32>
    %173 = arith.divf %171, %172 : vector<8x384xf32>
    %174 = vector.extract_strided_slice %167 {offsets = [0, 384], sizes = [8, 128], strides = [1, 1]} : vector<8x512xf32> to vector<8x128xf32>
    %175 = math.tanh %174 : vector<8x128xf32>
    %176 = vector.extract_strided_slice %173 {offsets = [0, 0], sizes = [8, 128], strides = [1, 1]} : vector<8x384xf32> to vector<8x128xf32>
    %177 = vector.extract_strided_slice %173 {offsets = [0, 128], sizes = [8, 128], strides = [1, 1]} : vector<8x384xf32> to vector<8x128xf32>
    %178 = vector.extract_strided_slice %173 {offsets = [0, 256], sizes = [8, 128], strides = [1, 1]} : vector<8x384xf32> to vector<8x128xf32>
    %179 = arith.mulf %177, %160 : vector<8x128xf32>
    %180 = arith.mulf %176, %175 : vector<8x128xf32>
    %181 = arith.addf %179, %180 : vector<8x128xf32>
    %182 = math.tanh %181 : vector<8x128xf32>
    %183 = arith.mulf %178, %182 : vector<8x128xf32>
    %c8_i32 = arith.constant 8 : i32
    %c0_50 = arith.constant 0 : index
    %c0_51 = arith.constant 0 : index
    %184 = vector.load %arg10[%c0_50, %c0_51] : memref<8x128xf32, #tpu.memory_space<vmem>>, vector<8x128xf32>
    tpu.vector_store %arg10[%c0_50, %c0_51], %183 {strides = array<i32>} : memref<8x128xf32, #tpu.memory_space<vmem>>, vector<8x128xf32>,
    %c0_52 = arith.constant 0 : index
    %c0_53 = arith.constant 0 : index
    %185 = vector.load %arg11[%c0_52, %c0_53] : memref<8x128xf32, #tpu.memory_space<vmem>>, vector<8x128xf32>
    tpu.vector_store %arg11[%c0_52, %c0_53], %181 {strides = array<i32>} : memref<8x128xf32, #tpu.memory_space<vmem>>, vector<8x128xf32>,
    %c0_i32_54 = arith.constant 0 : i32
    %186 = arith.cmpi eq, %arg1, %c0_i32_54 : i32
    %187 = arith.extui %186 : i1 to i32
    %c0_i32_55 = arith.constant 0 : i32
    %188 = arith.cmpi ne, %187, %c0_i32_55 : i32
    scf.if %188 {
      %c0_56 = arith.constant 0 : index
      %c0_57 = arith.constant 0 : index
      %189 = vector.load %arg6[%c0_56, %c0_57] : memref<128x128xf32, #tpu.memory_space<vmem>>, vector<128x128xf32>
      %cst_58 = arith.constant dense<0.000000e+00> : vector<8x128xf32>
      %190 = tpu.matmul %183, %189, %cst_58 {dimension_numbers = #tpu.dot_dimension_numbers<[1], [0], [0], [1], [0, 0, 1, 1], [], []>} : vector<8x128xf32>, vector<128x128xf32>, vector<8x128xf32> -> vector<8x128xf32>
      %c0_59 = arith.constant 0 : index
      %c0_60 = arith.constant 0 : index
      %191 = vector.load %arg7[%c0_59, %c0_60] : memref<1x128xf32, #tpu.memory_space<vmem>>, vector<1x128xf32>
      %192 = vector.broadcast %191 : vector<1x128xf32> to vector<8x128xf32>
      %193 = arith.addf %190, %192 : vector<8x128xf32>
      %c0_61 = arith.constant 0 : index
      %c0_62 = arith.constant 0 : index
      %194 = vector.load %arg8[%c0_61, %c0_62] : memref<8x128xf32, #tpu.memory_space<vmem>>, vector<8x128xf32>
      tpu.vector_store %arg8[%c0_61, %c0_62], %193 {strides = array<i32>} : memref<8x128xf32, #tpu.memory_space<vmem>>, vector<8x128xf32>,
    } else {
    }
    return
  }
  func.func @transform_0(%arg0: i32, %arg1: i32) -> (i32, i32, i32, i32) {
    %c0_i32 = arith.constant 0 : i32
    %c0_i32_0 = arith.constant 0 : i32
    %c0_i32_1 = arith.constant 0 : i32
    return %arg0, %arg1, %c0_i32, %c0_i32_0 : i32, i32, i32, i32
  }
  func.func @transform_1(%arg0: i32, %arg1: i32) -> (i32, i32) {
    %c0_i32 = arith.constant 0 : i32
    %c0_i32_0 = arith.constant 0 : i32
    %c0_i32_1 = arith.constant 0 : i32
    return %c0_i32, %c0_i32_0 : i32, i32
  }
  func.func @transform_2(%arg0: i32, %arg1: i32) -> (i32, i32) {
    %c0_i32 = arith.constant 0 : i32
    %c0_i32_0 = arith.constant 0 : i32
    %c0_i32_1 = arith.constant 0 : i32
    return %c0_i32, %c0_i32_0 : i32, i32
  }
  func.func @transform_3(%arg0: i32, %arg1: i32) -> (i32, i32) {
    %c0_i32 = arith.constant 0 : i32
    %c0_i32_0 = arith.constant 0 : i32
    %c0_i32_1 = arith.constant 0 : i32
    return %c0_i32, %c0_i32_0 : i32, i32
  }
  func.func @transform_4(%arg0: i32, %arg1: i32) -> (i32, i32) {
    %c0_i32 = arith.constant 0 : i32
    %c0_i32_0 = arith.constant 0 : i32
    %c0_i32_1 = arith.constant 0 : i32
    return %c0_i32, %c0_i32_0 : i32, i32
  }
  func.func @transform_5(%arg0: i32, %arg1: i32) -> (i32, i32) {
    %c0_i32 = arith.constant 0 : i32
    %c0_i32_0 = arith.constant 0 : i32
    %c0_i32_1 = arith.constant 0 : i32
    return %c0_i32, %c0_i32_0 : i32, i32
  }
  func.func @transform_6(%arg0: i32, %arg1: i32) -> (i32, i32) {
    %c0_i32 = arith.constant 0 : i32
    %c0_i32_0 = arith.constant 0 : i32
    return %arg0, %c0_i32 : i32, i32
  }
}

</mosaic_0001>

<bundles_post_ra>
// kernel: tpu_custom_call.1
= control target key start
LH: loop header
LB: loop body
LE: loop exit
PB: predicated region body
PF: predicated region fallthrough
CT: control target
= control target key end

     0   :  { %11 = vsyncpa [#allocation6], 0  ;;  %s3572_s0 = inlined_call_operand.hbm [shape: f32[1,8,8,128], index: 0, kind: input, shape index: {}]   ;;  %s3573_s1 = inlined_call_operand.hbm [shape: f32[128,512], index: 1, kind: input, shape index: {}]   ;;  %s3574_s2 = inlined_call_operand.hbm [shape: f32[128,512], index: 2, kind: input, shape index: {}]   ;;  %s3575_s3 = inlined_call_operand.vmem [shape: f32[1,512], index: 3, kind: input, shape index: {}]   ;;  %s3576_s4 = inlined_call_operand.hbm [shape: f32[128,128], index: 4, kind: input, shape index: {}]   ;;  %s3577_s5 = inlined_call_operand.vmem [shape: f32[1,128], index: 5, kind: input, shape index: {}]   ;;  %s3578_s6 = inlined_call_operand.hbm [shape: f32[8,128], index: 6, kind: output, shape index: {}]  }
   0x1   :  { %12 = vsyncpa [#allocation9], 0 }
   0x2   :  { %13 = vsyncpa [#allocation12], 0 }
   0x3   :  { %14 = vsyncpa [#allocation7], 0  ;;  %s3017_s21 = smov [#allocation8]   ;;  %s2899_s25 = scalar_lea.hbm %s3573_s1, 8192 }
   0x4   :  { %s32_s22 = sshll.u32 %s3017_s21, 4  ;;  %p2900_p0 = scmp.ne.s32.totalorder %s3573_s1, %s2899_s25  ;;  %s33_s22 = int_to_ptr.vmem [resolvable:$true] %s32_s22 }
   0x5   :  { %p2903_p1 = scmp.lt.u32.totalorder %s2899_s25, %s3573_s1 }
   0x7   :  { %p2905_p2 = pnand %p2903_p1, %p2900_p0 }
   0x9   :  { %2908 = shalt.err (!%p2905_p2)
}
   0xa   :  { %s2909_s30 = scalar_lea.vmem %s33_s22, 8192  ;;  %p2914_p4 = scmp.lt.s32.totalorder %s33_s22, %s33_s22 }
   0xb   :  { %p2910_p3 = scmp.ne.s32.totalorder %s33_s22, %s2909_s30  ;;  %p2915_p5 = scmp.lt.s32.totalorder %s2909_s30, %s2909_s30 }
   0xd   :  { %p2916_p6 = por %p2915_p5, %p2914_p4 }
   0xf   :  { %p2917_p7 = pnand %p2916_p6, %p2910_p3 }
  0x11   :  { %2920 = shalt.err (!%p2917_p7)
}
  0x12   :  { %s3018_s7 = smov 512   ;;  %s3019_s8 = smov 32  }
  0x13   :  { %38 = dma.hbm_to_vmem [thread:$0]  %s3573_s1, 8192, %s33_s22, [#allocation9], %s3018_s7, %s3018_s7, %s3019_s8  }
  0x14   :  { %s3020_s11 = smov [#allocation5]   ;;  %s2921_s15 = scalar_lea.hbm %s3572_s0, 1024 }
  0x15   :  { %s20_s12 = sshll.u32 %s3020_s11, 4  ;;  %p2922_p8 = scmp.ne.s32.totalorder %s3572_s0, %s2921_s15  ;;  %s21_s12 = int_to_ptr.vmem [resolvable:$true] %s20_s12 }
  0x16   :  { %p2925_p9 = scmp.lt.u32.totalorder %s2921_s15, %s3572_s0 }
  0x18   :  { %p2927_p10 = pnand %p2925_p9, %p2922_p8 }
  0x1a   :  { %2930 = shalt.err (!%p2927_p10)
}
  0x1b   :  { %s2931_s20 = scalar_lea.vmem %s21_s12, 1024  ;;  %p2936_p12 = scmp.lt.s32.totalorder %s21_s12, %s21_s12 }
  0x1c   :  { %p2932_p11 = scmp.ne.s32.totalorder %s21_s12, %s2931_s20  ;;  %p2937_p13 = scmp.lt.s32.totalorder %s2931_s20, %s2931_s20 }
  0x1e   :  { %p2938_p0 = por %p2937_p13, %p2936_p12 }
  0x20   :  { %p2939_p1 = pnand %p2938_p0, %p2932_p11 }
  0x22   :  { %2942 = shalt.err (!%p2939_p1)
}
  0x23   :  { %s3021_s1 = smov 128   ;;  %s3022_s21 = smov 8  }
  0x24   :  { %26 = dma.hbm_to_vmem [thread:$0]  %s3572_s0, 1024, %s21_s12, [#allocation6], %s3021_s1, %s3021_s1, %s3022_s21  }
  0x25   :  { %s3023_s24 = smov [#allocation10]   ;;  %s3024_s26 = smov [#allocation11]  }
  0x26   :  { %s44_s25 = sshll.u32 %s3023_s24, 4  ;;  %s58_s27 = sshll.u32 %s3024_s26, 4  ;;  %s45_s25 = int_to_ptr.vmem [resolvable:$true] %s44_s25  ;;  %s3094_s27 = int_to_ptr.vmem [resolvable:$true] %s58_s27 }
  0x27   :  { %s2943_s30 = scalar_lea.hbm %s3574_s2, 8192 }
  0x28   :  { %p2944_p2 = scmp.ne.s32.totalorder %s3574_s2, %s2943_s30  ;;  %p2947_p3 = scmp.lt.u32.totalorder %s2943_s30, %s3574_s2 }
  0x2a   :  { %p2949_p4 = pnand %p2947_p3, %p2944_p2 }
  0x2c   :  { %2952 = shalt.err (!%p2949_p4)
}
  0x2d   :  { %s2953_s0 = scalar_lea.vmem %s45_s25, 8192  ;;  %p2958_p6 = scmp.lt.s32.totalorder %s45_s25, %s45_s25 }
  0x2e   :  { %p2954_p5 = scmp.ne.s32.totalorder %s45_s25, %s2953_s0  ;;  %p2959_p7 = scmp.lt.s32.totalorder %s2953_s0, %s2953_s0 }
  0x30   :  { %p2960_p8 = por %p2959_p7, %p2958_p6 }
  0x32   :  { %p2961_p9 = pnand %p2960_p8, %p2954_p5 }
  0x34   :  { %2964 = shalt.err (!%p2961_p9)
}
  0x35   :  { %50 = dma.hbm_to_vmem [thread:$0]  %s3574_s2, 8192, %s45_s25, [#allocation9], %s3018_s7, %s3018_s7, %s3019_s8  }
  0x36   :  { %s2965_s17 = scalar_lea.hbm %s3576_s4, 2048 }
  0x37   :  { %p2966_p10 = scmp.ne.s32.totalorder %s3576_s4, %s2965_s17  ;;  %p2969_p11 = scmp.lt.u32.totalorder %s2965_s17, %s3576_s4 }
  0x39   :  { %p2971_p12 = pnand %p2969_p11, %p2966_p10 }
  0x3b   :  { %2974 = shalt.err (!%p2971_p12)
}
  0x3c   :  { %s2975_s23 = scalar_lea.vmem %s3094_s27, 2048  ;;  %p2980_p0 = scmp.lt.s32.totalorder %s3094_s27, %s3094_s27 }
  0x3d   :  { %p2976_p13 = scmp.ne.s32.totalorder %s3094_s27, %s2975_s23  ;;  %p2981_p1 = scmp.lt.s32.totalorder %s2975_s23, %s2975_s23 }
  0x3f   :  { %p2982_p2 = por %p2981_p1, %p2980_p0 }
  0x41   :  { %p2983_p3 = pnand %p2982_p2, %p2976_p13 }
  0x43   :  { %2986 = shalt.err (!%p2983_p3)
}
  0x44   :  { %64 = dma.hbm_to_vmem [thread:$0]  %s3576_s4, 2048, %s3094_s27, [#allocation12], %s3021_s1, %s3021_s1, %s3022_s21  }
  0x45   :  { %3009 = dma.done.wait [#allocation6], 1024  }
  0x46   :  { %3010 = vsyncadd [#allocation6], 4294966272 }
  0x47   :  { %3011 = dma.done.wait [#allocation9], 16384  }
  0x48   :  { %3012 = vsyncadd [#allocation9], 4294950912 }
  0x49   :  { %3013 = dma.done.wait [#allocation12], 2048  }
  0x4a   :  { %3014 = vsyncadd [#allocation12], 4294965248  ;;  %v3025_v0 = vmov 0.0   ;;  %v94_v1 = vld [vmem:[#allocation8 + $0x8] sm:$0xff]  ;;  %v96_v3 = vld [vmem:[#allocation8 + $0x18] sm:$0xff]  ;;  %vm3027_vm0 = vmmov 0  }
  0x4b   :  { %243 = vmatprep.mubr.f32.mxu0 %v3025_v0  ;;  %356 = vmatprep.mubr.f32.mxu1 %v3025_v0  ;;  %v98_v2 = vld [vmem:[#allocation8 + $0x28] sm:$0xff]  ;;  %v100_v5 = vld [vmem:[#allocation8 + $0x38] sm:$0xff]  ;;  %v93_v6 = vld [vmem:[#allocation8] sm:$0xff]  ;;  %s3028_s21 = smov [#allocation13]  }
  0x4c   :  { %v2095_v4 = vpack.c.bf16 %v98_v2, %v94_v1  ;;  %v97_v7 = vld [vmem:[#allocation8 + $0x20] sm:$0xff]  ;;  %v2127_v8 = vpack.c.bf16 %v100_v5, %v96_v3  ;;  %v95_v10 = vld [vmem:[#allocation8 + $0x10] sm:$0xff]  ;;  %v102_v12 = vld [vmem:[#allocation8 + $0x48] sm:$0xff]  ;;  %s2007_s24 = sshll.u32 %s3028_s21, 4  ;;  %s2008_s24 = int_to_ptr.vmem [resolvable:$true] %s2007_s24 }
  0x4d   :  { %v2097_v9 = vpack.c.bf16 %v97_v7, %v93_v6  ;;  %v99_v11 = vld [vmem:[#allocation8 + $0x30] sm:$0xff]  ;;  %v106_v14 = vld [vmem:[#allocation8 + $0x68] sm:$0xff]  ;;  %v104_v15 = vld [vmem:[#allocation8 + $0x58] sm:$0xff]  ;;  %s2987_s25 = scalar_lea.vmem %s2008_s24, 128  ;;  %p2992_p5 = scmp.lt.s32.totalorder %s2008_s24, %s2008_s24 }
  0x4e   :  { %2096 = vmatprep.subr.bf16.mxu0 %v2095_v4  ;;  %v2129_v13 = vpack.c.bf16 %v99_v11, %v95_v10  ;;  %v108_v16 = vld [vmem:[#allocation8 + $0x78] sm:$0xff]  ;;  %2128 = vmatprep.subr.bf16.mxu1 %v2127_v8  ;;  %v2099_v17 = vpack.c.bf16 %v106_v14, %v102_v12  ;;  %v101_v19 = vld [vmem:[#allocation8 + $0x40] sm:$0xff]  ;;  %v103_v21 = vld [vmem:[#allocation8 + $0x50] sm:$0xff]  ;;  %p2988_p4 = scmp.ne.s32.totalorder %s2008_s24, %s2987_s25  ;;  %p2993_p6 = scmp.lt.s32.totalorder %s2987_s25, %s2987_s25 }
  0x4f   :  { %2098 = vmatpush1.bf16.msra.mxu0 %v2097_v9  ;;  %v2131_v18 = vpack.c.bf16 %v108_v16, %v104_v15  ;;  %v105_v20 = vld [vmem:[#allocation8 + $0x60] sm:$0xff]  ;;  %v107_v23 = vld [vmem:[#allocation8 + $0x70] sm:$0xff]  ;;  %v110_v24 = vld [vmem:[#allocation8 + $0x88] sm:$0xff] }
  0x50   :  { %2130 = vmatpush1.bf16.msra.mxu1 %v2129_v13  ;;  %v2101_v22 = vpack.c.bf16 %v105_v20, %v101_v19  ;;  %v114_v25 = vld [vmem:[#allocation8 + $0xa8] sm:$0xff]  ;;  %2100 = vmatprep.subr.bf16.mxu0 %v2099_v17  ;;  %v2133_v26 = vpack.c.bf16 %v107_v23, %v103_v21  ;;  %v112_v28 = vld [vmem:[#allocation8 + $0x98] sm:$0xff]  ;;  %v109_v30 = vld [vmem:[#allocation8 + $0x80] sm:$0xff]  ;;  %p2994_p7 = por %p2993_p6, %p2992_p5 }
  0x51   :  { %2132 = vmatprep.subr.bf16.mxu1 %v2131_v18  ;;  %v2103_v27 = vpack.c.bf16 %v114_v25, %v110_v24  ;;  %v116_v29 = vld [vmem:[#allocation8 + $0xb8] sm:$0xff]  ;;  %v113_v32 = vld [vmem:[#allocation8 + $0xa0] sm:$0xff]  ;;  %v111_v33 = vld [vmem:[#allocation8 + $0x90] sm:$0xff] }
  0x52   :  { %v2135_v31 = vpack.c.bf16 %v116_v29, %v112_v28  ;;  %v115_v34 = vld [vmem:[#allocation8 + $0xb0] sm:$0xff]  ;;  %v2105_v35 = vpack.c.bf16 %v113_v32, %v109_v30  ;;  %v118_v36 = vld [vmem:[#allocation8 + $0xc8] sm:$0xff]  ;;  %v120_v38 = vld [vmem:[#allocation8 + $0xd8] sm:$0xff]  ;;  %p2995_p8 = pnand %p2994_p7, %p2988_p4 }
  0x53   :  { %2102 = vmatpush1.bf16.msra.mxu0 %v2101_v22  ;;  %v122_v37 = vld [vmem:[#allocation8 + $0xe8] sm:$0xff]  ;;  %v2137_v39 = vpack.c.bf16 %v115_v34, %v111_v33  ;;  %v124_v41 = vld [vmem:[#allocation8 + $0xf8] sm:$0xff]  ;;  %v117_v42 = vld [vmem:[#allocation8 + $0xc0] sm:$0xff] }
  0x54   :  { %2134 = vmatpush1.bf16.msra.mxu1 %v2133_v26  ;;  %2104 = vmatprep.subr.bf16.mxu0 %v2103_v27  ;;  %v2107_v40 = vpack.c.bf16 %v122_v37, %v118_v36  ;;  %v121_v43 = vld [vmem:[#allocation8 + $0xe0] sm:$0xff]  ;;  %v2139_v44 = vpack.c.bf16 %v124_v41, %v120_v38  ;;  %v119_v45 = vld [vmem:[#allocation8 + $0xd0] sm:$0xff]  ;;  %v126_v47 = vld [vmem:[#allocation8 + $0x108] sm:$0xff] }
  0x55   :  { %2136 = vmatprep.subr.bf16.mxu1 %v2135_v31  ;;  %v123_v46 = vld [vmem:[#allocation8 + $0xf0] sm:$0xff]  ;;  %v130_v48 = vld [vmem:[#allocation8 + $0x128] sm:$0xff]  ;;  %v128_v49 = vld [vmem:[#allocation8 + $0x118] sm:$0xff]  ;;  %v2109_v51 = vpack.c.bf16 %v121_v43, %v117_v42 }
  0x56   :  { %v132_v50 = vld [vmem:[#allocation8 + $0x138] sm:$0xff]  ;;  %v2141_v52 = vpack.c.bf16 %v123_v46, %v119_v45  ;;  %v2111_v53 = vpack.c.bf16 %v130_v48, %v126_v47  ;;  %v125_v54 = vld [vmem:[#allocation8 + $0x100] sm:$0xff]  ;;  %v127_v56 = vld [vmem:[#allocation8 + $0x110] sm:$0xff] }
  0x57   :  { %2106 = vmatpush1.bf16.msra.mxu0 %v2105_v35  ;;  %v129_v55 = vld [vmem:[#allocation8 + $0x120] sm:$0xff]  ;;  %v2143_v57 = vpack.c.bf16 %v132_v50, %v128_v49  ;;  %v131_v58 = vld [vmem:[#allocation8 + $0x130] sm:$0xff]  ;;  %v134_v59 = vld [vmem:[#allocation8 + $0x148] sm:$0xff] }
  0x58   :  { %2138 = vmatpush1.bf16.msra.mxu1 %v2137_v39  ;;  %2108 = vmatprep.subr.bf16.mxu0 %v2107_v40  ;;  %v138_v60 = vld [vmem:[#allocation8 + $0x168] sm:$0xff]  ;;  %v136_v61 = vld [vmem:[#allocation8 + $0x158] sm:$0xff]  ;;  %v2113_v63 = vpack.c.bf16 %v129_v55, %v125_v54  ;;  %v2145_v1 = vpack.c.bf16 %v131_v58, %v127_v56  ;;  %v133_v3 = vld [vmem:[#allocation8 + $0x140] sm:$0xff] }
  0x59   :  { %2140 = vmatprep.subr.bf16.mxu1 %v2139_v44  ;;  %v140_v62 = vld [vmem:[#allocation8 + $0x178] sm:$0xff]  ;;  %v2115_v2 = vpack.c.bf16 %v138_v60, %v134_v59  ;;  %v137_v4 = vld [vmem:[#allocation8 + $0x160] sm:$0xff]  ;;  %v135_v5 = vld [vmem:[#allocation8 + $0x150] sm:$0xff] }
  0x5a   :  { %v2147_v6 = vpack.c.bf16 %v140_v62, %v136_v61  ;;  %v139_v7 = vld [vmem:[#allocation8 + $0x170] sm:$0xff]  ;;  %v142_v8 = vld [vmem:[#allocation8 + $0x188] sm:$0xff]  ;;  %v144_v10 = vld [vmem:[#allocation8 + $0x198] sm:$0xff]  ;;  %v2117_v12 = vpack.c.bf16 %v137_v4, %v133_v3 }
  0x5b   :  { %2110 = vmatpush1.bf16.msra.mxu0 %v2109_v51  ;;  %v146_v9 = vld [vmem:[#allocation8 + $0x1a8] sm:$0xff]  ;;  %v148_v11 = vld [vmem:[#allocation8 + $0x1b8] sm:$0xff]  ;;  %v2149_v13 = vpack.c.bf16 %v139_v7, %v135_v5  ;;  %v141_v15 = vld [vmem:[#allocation8 + $0x180] sm:$0xff] }
  0x5c   :  { %2142 = vmatpush1.bf16.msra.mxu1 %v2141_v52  ;;  %2112 = vmatprep.subr.bf16.mxu0 %v2111_v53  ;;  %v2119_v14 = vpack.c.bf16 %v146_v9, %v142_v8  ;;  %v145_v16 = vld [vmem:[#allocation8 + $0x1a0] sm:$0xff]  ;;  %v143_v17 = vld [vmem:[#allocation8 + $0x190] sm:$0xff]  ;;  %v2151_v18 = vpack.c.bf16 %v148_v11, %v144_v10  ;;  %v150_v20 = vld [vmem:[#allocation8 + $0x1c8] sm:$0xff] }
  0x5d   :  { %2144 = vmatprep.subr.bf16.mxu1 %v2143_v57  ;;  %v147_v19 = vld [vmem:[#allocation8 + $0x1b0] sm:$0xff]  ;;  %v154_v21 = vld [vmem:[#allocation8 + $0x1e8] sm:$0xff]  ;;  %v152_v22 = vld [vmem:[#allocation8 + $0x1d8] sm:$0xff]  ;;  %v2121_v24 = vpack.c.bf16 %v145_v16, %v141_v15 }
  0x5e   :  { %v156_v23 = vld [vmem:[#allocation8 + $0x1f8] sm:$0xff]  ;;  %v2153_v25 = vpack.c.bf16 %v147_v19, %v143_v17  ;;  %v2123_v26 = vpack.c.bf16 %v154_v21, %v150_v20  ;;  %v149_v27 = vld [vmem:[#allocation8 + $0x1c0] sm:$0xff]  ;;  %v151_v29 = vld [vmem:[#allocation8 + $0x1d0] sm:$0xff] }
  0x5f   :  { %2114 = vmatpush1.bf16.msra.mxu0 %v2113_v63  ;;  %v153_v28 = vld [vmem:[#allocation8 + $0x1e0] sm:$0xff]  ;;  %v2155_v30 = vpack.c.bf16 %v156_v23, %v152_v22  ;;  %v155_v31 = vld [vmem:[#allocation8 + $0x1f0] sm:$0xff]  ;;  %v438_v32 = vld [vmem:[#allocation10 + $0x8] sm:$0xff] }
  0x60   :  { %2146 = vmatpush1.bf16.msra.mxu1 %v2145_v1  ;;  %2116 = vmatprep.subr.bf16.mxu0 %v2115_v2  ;;  %v442_v33 = vld [vmem:[#allocation10 + $0x28] sm:$0xff]  ;;  %v440_v34 = vld [vmem:[#allocation10 + $0x18] sm:$0xff]  ;;  %v2125_v36 = vpack.c.bf16 %v153_v28, %v149_v27  ;;  %v2157_v37 = vpack.c.bf16 %v155_v31, %v151_v29  ;;  %v437_v39 = vld [vmem:[#allocation10] sm:$0xff] }
  0x61   :  { %2148 = vmatprep.subr.bf16.mxu1 %v2147_v6  ;;  %v444_v35 = vld [vmem:[#allocation10 + $0x38] sm:$0xff]  ;;  %v3133_v38 = vpack.c.bf16 %v442_v33, %v438_v32  ;;  %v441_v40 = vld [vmem:[#allocation10 + $0x20] sm:$0xff]  ;;  %v439_v42 = vld [vmem:[#allocation10 + $0x10] sm:$0xff] }
  0x62   :  { %v3135_v41 = vpack.c.bf16 %v444_v35, %v440_v34  ;;  %v443_v43 = vld [vmem:[#allocation10 + $0x30] sm:$0xff]  ;;  %v446_v44 = vld [vmem:[#allocation10 + $0x48] sm:$0xff]  ;;  %v85_v46 = vld [vmem:[#allocation5] sm:$0xff]  ;;  %v3137_v47 = vpack.c.bf16 %v441_v40, %v437_v39 }
  0x63   :  { %2118 = vmatpush1.bf16.msra.mxu0 %v2117_v12  ;;  %v450_v45 = vld [vmem:[#allocation10 + $0x68] sm:$0xff]  ;;  %v448_v48 = vld [vmem:[#allocation10 + $0x58] sm:$0xff]  ;;  %v3140_v50 = vpack.c.bf16 %v443_v43, %v439_v42  ;;  %v445_v51 = vld [vmem:[#allocation10 + $0x40] sm:$0xff] }
  0x64   :  { %2150 = vmatpush1.bf16.msra.mxu1 %v2149_v13  ;;  %2120 = vmatprep.subr.bf16.mxu0 %v2119_v14  ;;  %v452_v49 = vld [vmem:[#allocation10 + $0x78] sm:$0xff]  ;;  %v449_v52 = vld [vmem:[#allocation10 + $0x60] sm:$0xff]  ;;  %v3143_v53 = vpack.c.bf16 %v450_v45, %v446_v44  ;;  %v447_v54 = vld [vmem:[#allocation10 + $0x50] sm:$0xff] }
  0x65   :  { %2152 = vmatprep.subr.bf16.mxu1 %v2151_v18  ;;  %v451_v55 = vld [vmem:[#allocation10 + $0x70] sm:$0xff]  ;;  %v3145_v56 = vpack.c.bf16 %v452_v49, %v448_v48  ;;  %v454_v57 = vld [vmem:[#allocation10 + $0x88] sm:$0xff]  ;;  %v3148_v60 = vpack.c.bf16 %v449_v52, %v445_v51  ;;  %v456_v61 = vld [vmem:[#allocation10 + $0x98] sm:$0xff] }
  0x66   :  { %v458_v58 = vld [vmem:[#allocation10 + $0xa8] sm:$0xff]  ;;  %v460_v62 = vld [vmem:[#allocation10 + $0xb8] sm:$0xff]  ;;  %v3152_v63 = vpack.c.bf16 %v451_v55, %v447_v54  ;;  %v453_v1 = vld [vmem:[#allocation10 + $0x80] sm:$0xff] }
  0x67   :  { %2122 = vmatpush1.bf16.msra.mxu0 %v2121_v24  ;;  %v86_v59 = vld [vmem:[#allocation5 + $0x8] sm:$0xff]  ;;  %v457_v2 = vld [vmem:[#allocation10 + $0xa0] sm:$0xff]  ;;  %v3156_v3 = vpack.c.bf16 %v458_v58, %v454_v57  ;;  %v455_v4 = vld [vmem:[#allocation10 + $0x90] sm:$0xff]  ;;  %v3159_v6 = vpack.c.bf16 %v460_v62, %v456_v61 }
  0x68   :  { %2154 = vmatpush1.bf16.msra.mxu1 %v2153_v25  ;;  %2124 = vmatprep.subr.bf16.mxu0 %v2123_v26  ;;  %v459_v5 = vld [vmem:[#allocation10 + $0xb0] sm:$0xff]  ;;  %v462_v7 = vld [vmem:[#allocation10 + $0xc8] sm:$0xff]  ;;  %v3162_v10 = vpack.c.bf16 %v457_v2, %v453_v1  ;;  %v464_v11 = vld [vmem:[#allocation10 + $0xd8] sm:$0xff] }
  0x69   :  { %2156 = vmatprep.subr.bf16.mxu1 %v2155_v30  ;;  %v466_v8 = vld [vmem:[#allocation10 + $0xe8] sm:$0xff]  ;;  %v87_v9 = vld [vmem:[#allocation5 + $0x10] sm:$0xff]  ;;  %v468_v12 = vld [vmem:[#allocation10 + $0xf8] sm:$0xff]  ;;  %v3166_v13 = vpack.c.bf16 %v459_v5, %v455_v4 }
  0x6a   :  { %v461_v14 = vld [vmem:[#allocation10 + $0xc0] sm:$0xff]  ;;  %v3170_v16 = vpack.c.bf16 %v466_v8, %v462_v7  ;;  %v463_v17 = vld [vmem:[#allocation10 + $0xd0] sm:$0xff]  ;;  %v3173_v19 = vpack.c.bf16 %v468_v12, %v464_v11  ;;  %v470_v20 = vld [vmem:[#allocation10 + $0x108] sm:$0xff] }
  0x6b   :  { %2126 = vmatpush1.bf16.msra.mxu0 %v2125_v36  ;;  %v465_v15 = vld [vmem:[#allocation10 + $0xe0] sm:$0xff]  ;;  %v467_v18 = vld [vmem:[#allocation10 + $0xf0] sm:$0xff]  ;;  %v474_v21 = vld [vmem:[#allocation10 + $0x128] sm:$0xff] }
  0x6c   :  { %2158 = vmatpush1.bf16.msra.mxu1 %v2157_v37  ;;  %2160 = vmatprep.subr.bf16.mxu0 %v3133_v38  ;;  %v88_v22 = vld [vmem:[#allocation5 + $0x18] sm:$0xff]  ;;  %v3176_v23 = vpack.c.bf16 %v465_v15, %v461_v14  ;;  %v3180_v26 = vpack.c.bf16 %v467_v18, %v463_v17  ;;  %v469_v27 = vld [vmem:[#allocation10 + $0x100] sm:$0xff]  ;;  %v3184_v29 = vpack.c.bf16 %v474_v21, %v470_v20  ;;  %v471_v30 = vld [vmem:[#allocation10 + $0x110] sm:$0xff] }
  0x6d   :  { %2192 = vmatprep.subr.bf16.mxu1 %v3135_v41  ;;  %v472_v24 = vld [vmem:[#allocation10 + $0x118] sm:$0xff]  ;;  %v473_v28 = vld [vmem:[#allocation10 + $0x120] sm:$0xff]  ;;  %v475_v31 = vld [vmem:[#allocation10 + $0x130] sm:$0xff] }
  0x6e   :  { %244 = vmatmul.mubr.f32.vlgmr.msra.gmra.mrb[0].mxu0 %v85_v46  ;;  %v476_v25 = vld [vmem:[#allocation10 + $0x138] sm:$0xff]  ;;  %v478_v33 = vld [vmem:[#allocation10 + $0x148] sm:$0xff]  ;;  %v89_v35 = vld [vmem:[#allocation5 + $0x20] sm:$0xff]  ;;  %v3190_v36 = vpack.c.bf16 %v473_v28, %v469_v27  ;;  %v3194_v40 = vpack.c.bf16 %v475_v31, %v471_v30  ;;  %v159_v28 = vlaneseq }
  0x6f   :  { %357 = vmatmul.mubr.f32.vlgmr.msra.gmra.mrb[0].mxu1 %v85_v46  ;;  %2162 = vmatpush1.bf16.msra.mxu0 %v3137_v47  ;;  %v3187_v32 = vpack.c.bf16 %v476_v25, %v472_v24  ;;  %v482_v34 = vld [vmem:[#allocation10 + $0x168] sm:$0xff]  ;;  %v480_v37 = vld [vmem:[#allocation10 + $0x158] sm:$0xff]  ;;  %v477_v42 = vld [vmem:[#allocation10 + $0x140] sm:$0xff] }
  0x70   :  { %2194 = vmatpush1.bf16.msra.mxu1 %v3140_v50  ;;  %249 = vmatprep.mubr.f32.mxu0 %v3025_v0  ;;  %v484_v39 = vld [vmem:[#allocation10 + $0x178] sm:$0xff]  ;;  %v481_v43 = vld [vmem:[#allocation10 + $0x160] sm:$0xff]  ;;  %v3198_v44 = vpack.c.bf16 %v482_v34, %v478_v33  ;;  %v479_v45 = vld [vmem:[#allocation10 + $0x150] sm:$0xff]  ;;  %v160_v30 = vshrl.u32 %v159_v28, 7 }
  0x71   :  { %362 = vmatprep.mubr.f32.mxu1 %v3025_v0  ;;  %2164 = vmatprep.subr.bf16.mxu0 %v3143_v53  ;;  %v483_v46 = vld [vmem:[#allocation10 + $0x170] sm:$0xff]  ;;  %v3201_v48 = vpack.c.bf16 %v484_v39, %v480_v37  ;;  %v486_v49 = vld [vmem:[#allocation10 + $0x188] sm:$0xff]  ;;  %v3204_v54 = vpack.c.bf16 %v481_v43, %v477_v42  ;;  %v488_v55 = vld [vmem:[#allocation10 + $0x198] sm:$0xff] }
  0x72   :  { %250 = vmatmul.mubr.f32.gmra.mrb[2].mxu0 %v86_v59  ;;  %2196 = vmatprep.subr.bf16.mxu1 %v3145_v56  ;;  %v490_v51 = vld [vmem:[#allocation10 + $0x1a8] sm:$0xff]  ;;  %v492_v57 = vld [vmem:[#allocation10 + $0x1b8] sm:$0xff]  ;;  %v3208_v58 = vpack.c.bf16 %v483_v46, %v479_v45  ;;  %v489_v61 = vld [vmem:[#allocation10 + $0x1a0] sm:$0xff]  ;;  %v161_v31 = vsub.s32 0, %v160_v30  ;;  %v165_v34 = vsub.s32 1, %v160_v30  ;;  %v169_v42 = vsub.s32 2, %v160_v30 }
  0x73   :  { %363 = vmatmul.mubr.f32.gmra.mrb[2].mxu1 %v86_v59  ;;  %2166 = vmatpush1.bf16.msra.mxu0 %v3148_v60  ;;  %v90_v52 = vld [vmem:[#allocation5 + $0x28] sm:$0xff]  ;;  %v485_v59 = vld [vmem:[#allocation10 + $0x180] sm:$0xff]  ;;  %v3212_v62 = vpack.c.bf16 %v490_v51, %v486_v49  ;;  %v487_v1 = vld [vmem:[#allocation10 + $0x190] sm:$0xff]  ;;  %v3215_v4 = vpack.c.bf16 %v492_v57, %v488_v55 }
  0x74   :  { %2198 = vmatpush1.bf16.msra.mxu1 %v3152_v63  ;;  %255 = vmatprep.mubr.f32.mxu0 %v3025_v0  ;;  %v491_v2 = vld [vmem:[#allocation10 + $0x1b0] sm:$0xff]  ;;  %v494_v5 = vld [vmem:[#allocation10 + $0x1c8] sm:$0xff]  ;;  %v496_v11 = vld [vmem:[#allocation10 + $0x1d8] sm:$0xff] }
  0x75   :  { %368 = vmatprep.mubr.f32.mxu1 %v3025_v0  ;;  %2168 = vmatprep.subr.bf16.mxu0 %v3156_v3  ;;  %v498_v7 = vld [vmem:[#allocation10 + $0x1e8] sm:$0xff]  ;;  %v91_v8 = vld [vmem:[#allocation5 + $0x30] sm:$0xff]  ;;  %v500_v12 = vld [vmem:[#allocation10 + $0x1f8] sm:$0xff]  ;;  %v3222_v14 = vpack.c.bf16 %v491_v2, %v487_v1 }
  0x76   :  { %256 = vmatmul.mubr.f32.gmra.mrb[4].mxu0 %v87_v9  ;;  %2200 = vmatprep.subr.bf16.mxu1 %v3159_v6  ;;  %v493_v15 = vld [vmem:[#allocation10 + $0x1c0] sm:$0xff]  ;;  %v3226_v18 = vpack.c.bf16 %v498_v7, %v494_v5  ;;  %v495_v20 = vld [vmem:[#allocation10 + $0x1d0] sm:$0xff]  ;;  %v92_v24 = vld [vmem:[#allocation5 + $0x38] sm:$0xff] }
  0x77   :  { %369 = vmatmul.mubr.f32.gmra.mrb[4].mxu1 %v87_v9  ;;  %2170 = vmatpush1.bf16.msra.mxu0 %v3162_v10  ;;  %v3218_v9 = vpack.c.bf16 %v489_v61, %v485_v59  ;;  %v497_v17 = vld [vmem:[#allocation10 + $0x1e0] sm:$0xff]  ;;  %v499_v21 = vld [vmem:[#allocation10 + $0x1f0] sm:$0xff]  ;;  %v173_v59 = vsub.s32 3, %v160_v30 }
  0x78   :  { %2202 = vmatpush1.bf16.msra.mxu1 %v3166_v13  ;;  %261 = vmatprep.mubr.f32.mxu0 %v3025_v0  ;;  %v3232_v25 = vpack.c.bf16 %v497_v17, %v493_v15  ;;  %v3236_v27 = vpack.c.bf16 %v499_v21, %v495_v20  ;;  %v157_v33 = vld [vmem:[%s3575_s3] sm:$0xf] }
  0x79   :  { %374 = vmatprep.mubr.f32.mxu1 %v3025_v0  ;;  %2172 = vmatprep.subr.bf16.mxu0 %v3170_v16  ;;  %v3288_v37 = vrot.slane %v157_v33, %v165_v34  ;;  %v3292_v55 = vrot.slane %v157_v33, %v169_v42  ;;  %v3295_v1 = vrot.slane %v157_v33, %v173_v59 }
  0x7a   :  { %262 = vmatmul.mubr.f32.gmra.mrb[6].mxu0 %v88_v22  ;;  %2204 = vmatprep.subr.bf16.mxu1 %v3173_v19 }
  0x7b   :  { %375 = vmatmul.mubr.f32.gmra.mrb[6].mxu1 %v88_v22  ;;  %2174 = vmatpush1.bf16.msra.mxu0 %v3176_v23  ;;  %v3229_v22 = vpack.c.bf16 %v500_v12, %v496_v11 }
  0x7c   :  { %2206 = vmatpush1.bf16.msra.mxu1 %v3180_v26  ;;  %267 = vmatprep.mubr.f32.mxu0 %v3025_v0 }
  0x7d   :  { %380 = vmatprep.mubr.f32.mxu1 %v3025_v0  ;;  %2176 = vmatprep.subr.bf16.mxu0 %v3184_v29 }
  0x7e   :  { %268 = vmatmul.mubr.f32.gmra.mrb[8].mxu0 %v89_v35  ;;  %2208 = vmatprep.subr.bf16.mxu1 %v3187_v32 }
  0x7f   :  { %381 = vmatmul.mubr.f32.gmra.mrb[8].mxu1 %v89_v35  ;;  %2178 = vmatpush1.bf16.msra.mxu0 %v3190_v36  ;;  %v3286_v35 = vrot.slane %v157_v33, %v161_v31 }
  0x80   :  { %2210 = vmatpush1.bf16.msra.mxu1 %v3194_v40  ;;  %273 = vmatprep.mubr.f32.mxu0 %v3025_v0 }
  0x81   :  { %386 = vmatprep.mubr.f32.mxu1 %v3025_v0  ;;  %2180 = vmatprep.subr.bf16.mxu0 %v3198_v44 }
  0x82   :  { %274 = vmatmul.mubr.f32.gmra.mrb[10].mxu0 %v90_v52  ;;  %2212 = vmatprep.subr.bf16.mxu1 %v3201_v48 }
  0x83   :  { %387 = vmatmul.mubr.f32.gmra.mrb[10].mxu1 %v90_v52  ;;  %2182 = vmatpush1.bf16.msra.mxu0 %v3204_v54 }
  0x84   :  { %2214 = vmatpush1.bf16.msra.mxu1 %v3208_v58  ;;  %279 = vmatprep.mubr.f32.mxu0 %v3025_v0 }
  0x85   :  { %392 = vmatprep.mubr.f32.mxu1 %v3025_v0  ;;  %2184 = vmatprep.subr.bf16.mxu0 %v3212_v62 }
  0x86   :  { %280 = vmatmul.mubr.f32.gmra.mrb[12].mxu0 %v91_v8  ;;  %2216 = vmatprep.subr.bf16.mxu1 %v3215_v4 }
  0x87   :  { %393 = vmatmul.mubr.f32.gmra.mrb[12].mxu1 %v91_v8  ;;  %2186 = vmatpush1.bf16.msra.mxu0 %v3218_v9 }
  0x88   :  { %2218 = vmatpush1.bf16.msra.mxu1 %v3222_v14  ;;  %285 = vmatprep.mubr.f32.mxu0 %v3025_v0 }
  0x89   :  { %398 = vmatprep.mubr.f32.mxu1 %v3025_v0  ;;  %2188 = vmatprep.subr.bf16.mxu0 %v3226_v18 }
  0x8a   :  { %286 = vmatmul.mubr.f32.gmra.mrb[14].mxu0 %v92_v24  ;;  %2220 = vmatprep.subr.bf16.mxu1 %v3229_v22 }
  0x8b   :  { %399 = vmatmul.mubr.f32.gmra.mrb[14].mxu1 %v92_v24  ;;  %2190 = vmatpush1.bf16.msra.mxu0 %v3232_v25 }
  0x8c   :  { %2222 = vmatpush1.bf16.msra.mxu1 %v3236_v27  ;;  %571 = vmatprep.mubr.f32.mxu0 %v3025_v0 }
  0x8d   :  { %642 = vmatprep.mubr.f32.mxu1 %v3025_v0  ;;  %2224 = vmatprep.subr.bf16.mxu0 %v3133_v38 }
  0x8e   :  { %572 = vmatmul.mubr.f32.vlgmr.msra.gmra.mrb[0].mxu0 %v3025_v0  ;;  %2256 = vmatprep.subr.bf16.mxu1 %v3135_v41 }
  0x8f   :  { %643 = vmatmul.mubr.f32.vlgmr.msra.gmra.mrb[0].mxu1 %v3025_v0  ;;  %2226 = vmatpush1.bf16.msra.mxu0 %v3137_v47 }
  0x90   :  { %2258 = vmatpush1.bf16.msra.mxu1 %v3140_v50  ;;  %2228 = vmatprep.subr.bf16.mxu0 %v3143_v53 }
  0x91   :  { %2260 = vmatprep.subr.bf16.mxu1 %v3145_v56  ;;  %746 = vmatprep.mubr.f32.mxu0 %v3025_v0 }
  0x92   :  { %817 = vmatprep.mubr.f32.mxu1 %v3025_v0 }
  0x93   :  { %2230 = vmatpush1.bf16.msra.mxu0 %v3148_v60 }
  0x94   :  { %2262 = vmatpush1.bf16.msra.mxu1 %v3152_v63  ;;  %2232 = vmatprep.subr.bf16.mxu0 %v3156_v3 }
  0x95   :  { %2264 = vmatprep.subr.bf16.mxu1 %v3159_v6 }
  0x97   :  { %2234 = vmatpush1.bf16.msra.mxu0 %v3162_v10 }
  0x98   :  { %2266 = vmatpush1.bf16.msra.mxu1 %v3166_v13  ;;  %2236 = vmatprep.subr.bf16.mxu0 %v3170_v16 }
  0x99   :  { %2268 = vmatprep.subr.bf16.mxu1 %v3173_v19 }
  0x9b   :  { %2238 = vmatpush1.bf16.msra.mxu0 %v3176_v23 }
  0x9c   :  { %2270 = vmatpush1.bf16.msra.mxu1 %v3180_v26  ;;  %2240 = vmatprep.subr.bf16.mxu0 %v3184_v29 }
  0x9d   :  { %2272 = vmatprep.subr.bf16.mxu1 %v3187_v32 }
  0x9f   :  { %2242 = vmatpush1.bf16.msra.mxu0 %v3190_v36 }
  0xa0   :  { %2274 = vmatpush1.bf16.msra.mxu1 %v3194_v40  ;;  %2244 = vmatprep.subr.bf16.mxu0 %v3198_v44 }
  0xa1   :  { %2276 = vmatprep.subr.bf16.mxu1 %v3201_v48 }
  0xa3   :  { %2246 = vmatpush1.bf16.msra.mxu0 %v3204_v54 }
  0xa4   :  { %2278 = vmatpush1.bf16.msra.mxu1 %v3208_v58  ;;  %2248 = vmatprep.subr.bf16.mxu0 %v3212_v62 }
  0xa5   :  { %2280 = vmatprep.subr.bf16.mxu1 %v3215_v4 }
  0xa7   :  { %2250 = vmatpush1.bf16.msra.mxu0 %v3218_v9 }
  0xa8   :  { %2282 = vmatpush1.bf16.msra.mxu1 %v3222_v14  ;;  %2252 = vmatprep.subr.bf16.mxu0 %v3226_v18 }
  0xa9   :  { %2284 = vmatprep.subr.bf16.mxu1 %v3229_v22 }
  0xab   :  { %2254 = vmatpush1.bf16.msra.mxu0 %v3232_v25 }
  0xac   :  { %2286 = vmatpush1.bf16.msra.mxu1 %v3236_v27  ;;  %2288 = vmatprep.subr.bf16.mxu0 %v3133_v38 }
  0xad   :  { %2320 = vmatprep.subr.bf16.mxu1 %v3135_v41 }
 0x161   :  { %v573_v39 = vpop.f32.mrb[0].mxu0 }
 0x162   :  { %v2695_v43 = vadd.f32 %v573_v39, %v3286_v35  ;;  %v644_v45 = vpop.f32.mrb[0].mxu1  ;;  %v575_v46 = vpop.f32.mrb[1].mxu0 }
 0x163   :  { %v2696_v49 = vadd.f32 %v575_v46, %v3288_v37  ;;  %v646_v51 = vpop.f32.mrb[1].mxu1  ;;  %v2711_v61 = vadd.f32 %v644_v45, %v3292_v55 }
 0x164   :  { %v2018_v52 = vmul.f32 -1.442695, %v2695_v43  ;;  %v2712_v5 = vadd.f32 %v646_v51, %v3295_v1 }
 0x165   :  { %v2019_v57 = vmul.f32 -1.442695, %v2696_v49  ;;  %v2020_v2 = vmul.f32 -1.442695, %v2711_v61 }
 0x166   :  { %2771 = vpow2.f32 %v2018_v52 }
 0x167   :  { %2773 = vpow2.f32 %v2019_v57 }
 0x168   :  { %2775 = vpow2.f32 %v2020_v2 }
 0x169   :  { %2777 = vtanh.f32 %v2712_v5 }
 0x170   :  { %v2772_v7 = vpop.eup %2771 }
 0x171   :  { %v662_v8 = vadd.f32 1.0, %v2772_v7  ;;  %v2774_v11 = vpop.eup %2773 }
 0x172   :  { %v663_v12 = vadd.f32 1.0, %v2774_v11  ;;  %v2776_v15 = vpop.eup %2775 }
 0x173   :  { %2779 = vrcp.f32 %v662_v8  ;;  %v2778_v17 = vpop.eup %2777  ;;  %v664_v28 = vadd.f32 1.0, %v2776_v15 }
 0x174   :  { %2781 = vrcp.f32 %v663_v12 }
 0x175   :  { %2783 = vrcp.f32 %v664_v28 }
 0x17d   :  { %v2780_v20 = vpop.eup %2779 }
 0x17e   :  { %v673_v21 = vmul.f32 %v2780_v20, %v2778_v17  ;;  %v2782_v24 = vpop.eup %2781 }
 0x17f   :  { %v672_v30 = vmul.f32 0.0, %v2782_v24  ;;  %v2784_v33 = vpop.eup %2783 }
 0x181   :  { %v3298_v31 = vadd.f32 %v673_v21, %v672_v30 }
 0x183   :  { %2785 = vtanh.f32 %v3298_v31 }
 0x18d   :  { %v2786_v34 = vpop.eup %2785 }
 0x18e   :  { %v676_v39 = vmul.f32 %v2786_v34, %v2784_v33 }
 0x190   :  { %747 = vmatmul.mubr.f32.vlgmr.msra.gmra.mrb[2].mxu0 %v676_v39  ;;  %818 = vmatmul.mubr.f32.vlgmr.msra.gmra.mrb[2].mxu1 %v676_v39 }
 0x191   :  { %2290 = vmatpush1.bf16.msra.mxu0 %v3137_v47  ;;  %2322 = vmatpush1.bf16.msra.mxu1 %v3140_v50 }
 0x192   :  { %2292 = vmatprep.subr.bf16.mxu0 %v3143_v53  ;;  %2324 = vmatprep.subr.bf16.mxu1 %v3145_v56 }
 0x193   :  { %921 = vmatprep.mubr.f32.mxu0 %v3025_v0  ;;  %992 = vmatprep.mubr.f32.mxu1 %v3025_v0 }
 0x195   :  { %2294 = vmatpush1.bf16.msra.mxu0 %v3148_v60  ;;  %2326 = vmatpush1.bf16.msra.mxu1 %v3152_v63 }
 0x196   :  { %2296 = vmatprep.subr.bf16.mxu0 %v3156_v3  ;;  %2328 = vmatprep.subr.bf16.mxu1 %v3159_v6 }
 0x199   :  { %2298 = vmatpush1.bf16.msra.mxu0 %v3162_v10  ;;  %2330 = vmatpush1.bf16.msra.mxu1 %v3166_v13 }
 0x19a   :  { %2300 = vmatprep.subr.bf16.mxu0 %v3170_v16  ;;  %2332 = vmatprep.subr.bf16.mxu1 %v3173_v19 }
 0x19d   :  { %2302 = vmatpush1.bf16.msra.mxu0 %v3176_v23  ;;  %2334 = vmatpush1.bf16.msra.mxu1 %v3180_v26 }
 0x19e   :  { %2304 = vmatprep.subr.bf16.mxu0 %v3184_v29  ;;  %2336 = vmatprep.subr.bf16.mxu1 %v3187_v32 }
 0x1a1   :  { %2306 = vmatpush1.bf16.msra.mxu0 %v3190_v36  ;;  %2338 = vmatpush1.bf16.msra.mxu1 %v3194_v40 }
 0x1a2   :  { %2308 = vmatprep.subr.bf16.mxu0 %v3198_v44  ;;  %2340 = vmatprep.subr.bf16.mxu1 %v3201_v48 }
 0x1a5   :  { %2310 = vmatpush1.bf16.msra.mxu0 %v3204_v54  ;;  %2342 = vmatpush1.bf16.msra.mxu1 %v3208_v58 }
 0x1a6   :  { %2312 = vmatprep.subr.bf16.mxu0 %v3212_v62  ;;  %2344 = vmatprep.subr.bf16.mxu1 %v3215_v4 }
 0x1a9   :  { %2314 = vmatpush1.bf16.msra.mxu0 %v3218_v9  ;;  %2346 = vmatpush1.bf16.msra.mxu1 %v3222_v14 }
 0x1aa   :  { %2316 = vmatprep.subr.bf16.mxu0 %v3226_v18  ;;  %2348 = vmatprep.subr.bf16.mxu1 %v3229_v22 }
 0x1ad   :  { %2318 = vmatpush1.bf16.msra.mxu0 %v3232_v25  ;;  %2350 = vmatpush1.bf16.msra.mxu1 %v3236_v27 }
 0x1ae   :  { %2352 = vmatprep.subr.bf16.mxu0 %v3133_v38  ;;  %2384 = vmatprep.subr.bf16.mxu1 %v3135_v41 }
 0x263   :  { %v748_v42 = vpop.f32.mrb[2].mxu0  ;;  %v819_v43 = vpop.f32.mrb[2].mxu1 }
 0x264   :  { %v2697_v45 = vadd.f32 %v748_v42, %v3286_v35  ;;  %v750_v46 = vpop.f32.mrb[3].mxu0  ;;  %v821_v49 = vpop.f32.mrb[3].mxu1  ;;  %v2713_v59 = vadd.f32 %v819_v43, %v3292_v55 }
 0x265   :  { %v2698_v51 = vadd.f32 %v750_v46, %v3288_v37  ;;  %v2714_v61 = vadd.f32 %v821_v49, %v3295_v1 }
 0x266   :  { %v2021_v52 = vmul.f32 -1.442695, %v2697_v45  ;;  %v2023_v2 = vmul.f32 -1.442695, %v2713_v59 }
 0x267   :  { %v2022_v57 = vmul.f32 -1.442695, %v2698_v51 }
 0x268   :  { %2787 = vpow2.f32 %v2021_v52 }
 0x269   :  { %2789 = vpow2.f32 %v2022_v57 }
 0x26a   :  { %2791 = vtanh.f32 %v2714_v61 }
 0x26b   :  { %2793 = vpow2.f32 %v2023_v2 }
 0x272   :  { %v2788_v5 = vpop.eup %2787 }
 0x273   :  { %v837_v7 = vadd.f32 1.0, %v2788_v5  ;;  %v2790_v8 = vpop.eup %2789 }
 0x274   :  { %v838_v11 = vadd.f32 1.0, %v2790_v8  ;;  %v2792_v12 = vpop.eup %2791 }
 0x275   :  { %2795 = vrcp.f32 %v837_v7  ;;  %v2794_v15 = vpop.eup %2793 }
 0x276   :  { %2797 = vrcp.f32 %v838_v11  ;;  %v839_v24 = vadd.f32 1.0, %v2794_v15 }
 0x278   :  { %2799 = vrcp.f32 %v839_v24 }
 0x27f   :  { %v2796_v17 = vpop.eup %2795 }
 0x280   :  { %v848_v20 = vmul.f32 %v2796_v17, %v2792_v12  ;;  %v2798_v21 = vpop.eup %2797 }
 0x281   :  { %v847_v28 = vmul.f32 %v2798_v21, %v3298_v31 }
 0x282   :  { %v2800_v33 = vpop.eup %2799 }
 0x283   :  { %v3340_v30 = vadd.f32 %v848_v20, %v847_v28 }
 0x285   :  { %2801 = vtanh.f32 %v3340_v30 }
 0x28f   :  { %v2802_v34 = vpop.eup %2801 }
 0x290   :  { %v851_v39 = vmul.f32 %v2802_v34, %v2800_v33 }
 0x292   :  { %922 = vmatmul.mubr.f32.vlgmr.msra.gmra.mrb[4].mxu0 %v851_v39  ;;  %993 = vmatmul.mubr.f32.vlgmr.msra.gmra.mrb[4].mxu1 %v851_v39 }
 0x293   :  { %2354 = vmatpush1.bf16.msra.mxu0 %v3137_v47  ;;  %2386 = vmatpush1.bf16.msra.mxu1 %v3140_v50 }
 0x294   :  { %2356 = vmatprep.subr.bf16.mxu0 %v3143_v53  ;;  %2388 = vmatprep.subr.bf16.mxu1 %v3145_v56 }
 0x295   :  { %1096 = vmatprep.mubr.f32.mxu0 %v3025_v0  ;;  %1167 = vmatprep.mubr.f32.mxu1 %v3025_v0 }
 0x297   :  { %2358 = vmatpush1.bf16.msra.mxu0 %v3148_v60  ;;  %2390 = vmatpush1.bf16.msra.mxu1 %v3152_v63 }
 0x298   :  { %2360 = vmatprep.subr.bf16.mxu0 %v3156_v3  ;;  %2392 = vmatprep.subr.bf16.mxu1 %v3159_v6 }
 0x29b   :  { %2362 = vmatpush1.bf16.msra.mxu0 %v3162_v10  ;;  %2394 = vmatpush1.bf16.msra.mxu1 %v3166_v13 }
 0x29c   :  { %2364 = vmatprep.subr.bf16.mxu0 %v3170_v16  ;;  %2396 = vmatprep.subr.bf16.mxu1 %v3173_v19 }
 0x29f   :  { %2366 = vmatpush1.bf16.msra.mxu0 %v3176_v23  ;;  %2398 = vmatpush1.bf16.msra.mxu1 %v3180_v26 }
 0x2a0   :  { %2368 = vmatprep.subr.bf16.mxu0 %v3184_v29  ;;  %2400 = vmatprep.subr.bf16.mxu1 %v3187_v32 }
 0x2a3   :  { %2370 = vmatpush1.bf16.msra.mxu0 %v3190_v36  ;;  %2402 = vmatpush1.bf16.msra.mxu1 %v3194_v40 }
 0x2a4   :  { %2372 = vmatprep.subr.bf16.mxu0 %v3198_v44  ;;  %2404 = vmatprep.subr.bf16.mxu1 %v3201_v48 }
 0x2a7   :  { %2374 = vmatpush1.bf16.msra.mxu0 %v3204_v54  ;;  %2406 = vmatpush1.bf16.msra.mxu1 %v3208_v58 }
 0x2a8   :  { %2376 = vmatprep.subr.bf16.mxu0 %v3212_v62  ;;  %2408 = vmatprep.subr.bf16.mxu1 %v3215_v4 }
 0x2ab   :  { %2378 = vmatpush1.bf16.msra.mxu0 %v3218_v9  ;;  %2410 = vmatpush1.bf16.msra.mxu1 %v3222_v14 }
 0x2ac   :  { %2380 = vmatprep.subr.bf16.mxu0 %v3226_v18  ;;  %2412 = vmatprep.subr.bf16.mxu1 %v3229_v22 }
 0x2af   :  { %2382 = vmatpush1.bf16.msra.mxu0 %v3232_v25  ;;  %2414 = vmatpush1.bf16.msra.mxu1 %v3236_v27 }
 0x2b0   :  { %2416 = vmatprep.subr.bf16.mxu0 %v3133_v38  ;;  %2448 = vmatprep.subr.bf16.mxu1 %v3135_v41 }
 0x365   :  { %v923_v31 = vpop.f32.mrb[4].mxu0  ;;  %v994_v42 = vpop.f32.mrb[4].mxu1 }
 0x366   :  { %v2699_v43 = vadd.f32 %v923_v31, %v3286_v35  ;;  %v925_v45 = vpop.f32.mrb[5].mxu0  ;;  %v996_v46 = vpop.f32.mrb[5].mxu1  ;;  %v2715_v57 = vadd.f32 %v994_v42, %v3292_v55 }
 0x367   :  { %v2700_v49 = vadd.f32 %v925_v45, %v3288_v37  ;;  %v2716_v59 = vadd.f32 %v996_v46, %v3295_v1 }
 0x368   :  { %v2024_v51 = vmul.f32 -1.442695, %v2699_v43  ;;  %v2026_v61 = vmul.f32 -1.442695, %v2715_v57 }
 0x369   :  { %v2025_v52 = vmul.f32 -1.442695, %v2700_v49 }
 0x36a   :  { %2803 = vpow2.f32 %v2024_v51 }
 0x36b   :  { %2805 = vpow2.f32 %v2025_v52 }
 0x36c   :  { %2807 = vtanh.f32 %v2716_v59 }
 0x36d   :  { %2809 = vpow2.f32 %v2026_v61 }
 0x374   :  { %v2804_v2 = vpop.eup %2803 }
 0x375   :  { %v1012_v5 = vadd.f32 1.0, %v2804_v2  ;;  %v2806_v7 = vpop.eup %2805 }
 0x376   :  { %v1013_v8 = vadd.f32 1.0, %v2806_v7  ;;  %v2808_v11 = vpop.eup %2807 }
 0x377   :  { %2811 = vrcp.f32 %v1012_v5  ;;  %v2810_v12 = vpop.eup %2809 }
 0x378   :  { %2813 = vrcp.f32 %v1013_v8  ;;  %v1014_v21 = vadd.f32 1.0, %v2810_v12 }
 0x37a   :  { %2815 = vrcp.f32 %v1014_v21 }
 0x381   :  { %v2812_v15 = vpop.eup %2811 }
 0x382   :  { %v1023_v17 = vmul.f32 %v2812_v15, %v2808_v11  ;;  %v2814_v20 = vpop.eup %2813 }
 0x383   :  { %v1022_v24 = vmul.f32 %v2814_v20, %v3340_v30 }
 0x384   :  { %v2816_v33 = vpop.eup %2815 }
 0x385   :  { %v3382_v28 = vadd.f32 %v1023_v17, %v1022_v24 }
 0x387   :  { %2817 = vtanh.f32 %v3382_v28 }
 0x391   :  { %v2818_v34 = vpop.eup %2817 }
 0x392   :  { %v1026_v39 = vmul.f32 %v2818_v34, %v2816_v33 }
 0x394   :  { %1097 = vmatmul.mubr.f32.vlgmr.msra.gmra.mrb[6].mxu0 %v1026_v39  ;;  %1168 = vmatmul.mubr.f32.vlgmr.msra.gmra.mrb[6].mxu1 %v1026_v39 }
 0x395   :  { %2418 = vmatpush1.bf16.msra.mxu0 %v3137_v47  ;;  %2450 = vmatpush1.bf16.msra.mxu1 %v3140_v50 }
 0x396   :  { %2420 = vmatprep.subr.bf16.mxu0 %v3143_v53  ;;  %2452 = vmatprep.subr.bf16.mxu1 %v3145_v56 }
 0x397   :  { %1271 = vmatprep.mubr.f32.mxu0 %v3025_v0  ;;  %1342 = vmatprep.mubr.f32.mxu1 %v3025_v0 }
 0x399   :  { %2422 = vmatpush1.bf16.msra.mxu0 %v3148_v60  ;;  %2454 = vmatpush1.bf16.msra.mxu1 %v3152_v63 }
 0x39a   :  { %2424 = vmatprep.subr.bf16.mxu0 %v3156_v3  ;;  %2456 = vmatprep.subr.bf16.mxu1 %v3159_v6 }
 0x39d   :  { %2426 = vmatpush1.bf16.msra.mxu0 %v3162_v10  ;;  %2458 = vmatpush1.bf16.msra.mxu1 %v3166_v13 }
 0x39e   :  { %2428 = vmatprep.subr.bf16.mxu0 %v3170_v16  ;;  %2460 = vmatprep.subr.bf16.mxu1 %v3173_v19 }
 0x3a1   :  { %2430 = vmatpush1.bf16.msra.mxu0 %v3176_v23  ;;  %2462 = vmatpush1.bf16.msra.mxu1 %v3180_v26 }
 0x3a2   :  { %2432 = vmatprep.subr.bf16.mxu0 %v3184_v29  ;;  %2464 = vmatprep.subr.bf16.mxu1 %v3187_v32 }
 0x3a5   :  { %2434 = vmatpush1.bf16.msra.mxu0 %v3190_v36  ;;  %2466 = vmatpush1.bf16.msra.mxu1 %v3194_v40 }
 0x3a6   :  { %2436 = vmatprep.subr.bf16.mxu0 %v3198_v44  ;;  %2468 = vmatprep.subr.bf16.mxu1 %v3201_v48 }
 0x3a9   :  { %2438 = vmatpush1.bf16.msra.mxu0 %v3204_v54  ;;  %2470 = vmatpush1.bf16.msra.mxu1 %v3208_v58 }
 0x3aa   :  { %2440 = vmatprep.subr.bf16.mxu0 %v3212_v62  ;;  %2472 = vmatprep.subr.bf16.mxu1 %v3215_v4 }
 0x3ad   :  { %2442 = vmatpush1.bf16.msra.mxu0 %v3218_v9  ;;  %2474 = vmatpush1.bf16.msra.mxu1 %v3222_v14 }
 0x3ae   :  { %2444 = vmatprep.subr.bf16.mxu0 %v3226_v18  ;;  %2476 = vmatprep.subr.bf16.mxu1 %v3229_v22 }
 0x3b1   :  { %2446 = vmatpush1.bf16.msra.mxu0 %v3232_v25  ;;  %2478 = vmatpush1.bf16.msra.mxu1 %v3236_v27 }
 0x3b2   :  { %2480 = vmatprep.subr.bf16.mxu0 %v3133_v38  ;;  %2512 = vmatprep.subr.bf16.mxu1 %v3135_v41 }
 0x467   :  { %v1098_v30 = vpop.f32.mrb[6].mxu0  ;;  %v1169_v31 = vpop.f32.mrb[6].mxu1 }
 0x468   :  { %v2701_v42 = vadd.f32 %v1098_v30, %v3286_v35  ;;  %v1100_v43 = vpop.f32.mrb[7].mxu0  ;;  %v1171_v45 = vpop.f32.mrb[7].mxu1  ;;  %v2717_v52 = vadd.f32 %v1169_v31, %v3292_v55 }
 0x469   :  { %v2702_v46 = vadd.f32 %v1100_v43, %v3288_v37  ;;  %v2718_v57 = vadd.f32 %v1171_v45, %v3295_v1 }
 0x46a   :  { %v2027_v49 = vmul.f32 -1.442695, %v2701_v42  ;;  %v2029_v59 = vmul.f32 -1.442695, %v2717_v52 }
 0x46b   :  { %v2028_v51 = vmul.f32 -1.442695, %v2702_v46 }
 0x46c   :  { %2819 = vpow2.f32 %v2027_v49 }
 0x46d   :  { %2821 = vpow2.f32 %v2028_v51 }
 0x46e   :  { %2823 = vtanh.f32 %v2718_v57 }
 0x46f   :  { %2825 = vpow2.f32 %v2029_v59 }
 0x476   :  { %v2820_v61 = vpop.eup %2819 }
 0x477   :  { %v1187_v2 = vadd.f32 1.0, %v2820_v61  ;;  %v2822_v5 = vpop.eup %2821 }
 0x478   :  { %v1188_v7 = vadd.f32 1.0, %v2822_v5  ;;  %v2824_v8 = vpop.eup %2823 }
 0x479   :  { %2827 = vrcp.f32 %v1187_v2  ;;  %v2826_v11 = vpop.eup %2825 }
 0x47a   :  { %2829 = vrcp.f32 %v1188_v7  ;;  %v1189_v20 = vadd.f32 1.0, %v2826_v11 }
 0x47c   :  { %2831 = vrcp.f32 %v1189_v20 }
 0x483   :  { %v2828_v12 = vpop.eup %2827 }
 0x484   :  { %v1198_v15 = vmul.f32 %v2828_v12, %v2824_v8  ;;  %v2830_v17 = vpop.eup %2829 }
 0x485   :  { %v1197_v21 = vmul.f32 %v2830_v17, %v3382_v28 }
 0x486   :  { %v2832_v33 = vpop.eup %2831 }
 0x487   :  { %v3424_v24 = vadd.f32 %v1198_v15, %v1197_v21 }
 0x489   :  { %2833 = vtanh.f32 %v3424_v24 }
 0x493   :  { %v2834_v34 = vpop.eup %2833 }
 0x494   :  { %v1201_v39 = vmul.f32 %v2834_v34, %v2832_v33 }
 0x496   :  { %1272 = vmatmul.mubr.f32.vlgmr.msra.gmra.mrb[8].mxu0 %v1201_v39  ;;  %1343 = vmatmul.mubr.f32.vlgmr.msra.gmra.mrb[8].mxu1 %v1201_v39 }
 0x497   :  { %2482 = vmatpush1.bf16.msra.mxu0 %v3137_v47  ;;  %2514 = vmatpush1.bf16.msra.mxu1 %v3140_v50 }
 0x498   :  { %2484 = vmatprep.subr.bf16.mxu0 %v3143_v53  ;;  %2516 = vmatprep.subr.bf16.mxu1 %v3145_v56 }
 0x499   :  { %1446 = vmatprep.mubr.f32.mxu0 %v3025_v0  ;;  %1517 = vmatprep.mubr.f32.mxu1 %v3025_v0 }
 0x49b   :  { %2486 = vmatpush1.bf16.msra.mxu0 %v3148_v60  ;;  %2518 = vmatpush1.bf16.msra.mxu1 %v3152_v63 }
 0x49c   :  { %2488 = vmatprep.subr.bf16.mxu0 %v3156_v3  ;;  %2520 = vmatprep.subr.bf16.mxu1 %v3159_v6 }
 0x49f   :  { %2490 = vmatpush1.bf16.msra.mxu0 %v3162_v10  ;;  %2522 = vmatpush1.bf16.msra.mxu1 %v3166_v13 }
 0x4a0   :  { %2492 = vmatprep.subr.bf16.mxu0 %v3170_v16  ;;  %2524 = vmatprep.subr.bf16.mxu1 %v3173_v19 }
 0x4a3   :  { %2494 = vmatpush1.bf16.msra.mxu0 %v3176_v23  ;;  %2526 = vmatpush1.bf16.msra.mxu1 %v3180_v26 }
 0x4a4   :  { %2496 = vmatprep.subr.bf16.mxu0 %v3184_v29  ;;  %2528 = vmatprep.subr.bf16.mxu1 %v3187_v32 }
 0x4a7   :  { %2498 = vmatpush1.bf16.msra.mxu0 %v3190_v36  ;;  %2530 = vmatpush1.bf16.msra.mxu1 %v3194_v40 }
 0x4a8   :  { %2500 = vmatprep.subr.bf16.mxu0 %v3198_v44  ;;  %2532 = vmatprep.subr.bf16.mxu1 %v3201_v48 }
 0x4ab   :  { %2502 = vmatpush1.bf16.msra.mxu0 %v3204_v54  ;;  %2534 = vmatpush1.bf16.msra.mxu1 %v3208_v58 }
 0x4ac   :  { %2504 = vmatprep.subr.bf16.mxu0 %v3212_v62  ;;  %2536 = vmatprep.subr.bf16.mxu1 %v3215_v4 }
 0x4af   :  { %2506 = vmatpush1.bf16.msra.mxu0 %v3218_v9  ;;  %2538 = vmatpush1.bf16.msra.mxu1 %v3222_v14 }
 0x4b0   :  { %2508 = vmatprep.subr.bf16.mxu0 %v3226_v18  ;;  %2540 = vmatprep.subr.bf16.mxu1 %v3229_v22 }
 0x4b3   :  { %2510 = vmatpush1.bf16.msra.mxu0 %v3232_v25  ;;  %2542 = vmatpush1.bf16.msra.mxu1 %v3236_v27 }
 0x4b4   :  { %2544 = vmatprep.subr.bf16.mxu0 %v3133_v38  ;;  %2576 = vmatprep.subr.bf16.mxu1 %v3135_v41 }
 0x569   :  { %v1273_v28 = vpop.f32.mrb[8].mxu0  ;;  %v1344_v30 = vpop.f32.mrb[8].mxu1 }
 0x56a   :  { %v2703_v31 = vadd.f32 %v1273_v28, %v3286_v35  ;;  %v1275_v42 = vpop.f32.mrb[9].mxu0  ;;  %v1346_v43 = vpop.f32.mrb[9].mxu1  ;;  %v2719_v51 = vadd.f32 %v1344_v30, %v3292_v55 }
 0x56b   :  { %v2704_v45 = vadd.f32 %v1275_v42, %v3288_v37  ;;  %v2720_v52 = vadd.f32 %v1346_v43, %v3295_v1 }
 0x56c   :  { %v2030_v46 = vmul.f32 -1.442695, %v2703_v31  ;;  %v2032_v57 = vmul.f32 -1.442695, %v2719_v51 }
 0x56d   :  { %v2031_v49 = vmul.f32 -1.442695, %v2704_v45 }
 0x56e   :  { %2835 = vpow2.f32 %v2030_v46 }
 0x56f   :  { %2837 = vpow2.f32 %v2031_v49 }
 0x570   :  { %2839 = vtanh.f32 %v2720_v52 }
 0x571   :  { %2841 = vpow2.f32 %v2032_v57 }
 0x578   :  { %v2836_v59 = vpop.eup %2835 }
 0x579   :  { %v1362_v61 = vadd.f32 1.0, %v2836_v59  ;;  %v2838_v2 = vpop.eup %2837 }
 0x57a   :  { %v1363_v5 = vadd.f32 1.0, %v2838_v2  ;;  %v2840_v7 = vpop.eup %2839 }
 0x57b   :  { %2843 = vrcp.f32 %v1362_v61  ;;  %v2842_v8 = vpop.eup %2841 }
 0x57c   :  { %2845 = vrcp.f32 %v1363_v5  ;;  %v1364_v17 = vadd.f32 1.0, %v2842_v8 }
 0x57e   :  { %2847 = vrcp.f32 %v1364_v17 }
 0x585   :  { %v2844_v11 = vpop.eup %2843 }
 0x586   :  { %v1373_v12 = vmul.f32 %v2844_v11, %v2840_v7  ;;  %v2846_v15 = vpop.eup %2845 }
 0x587   :  { %v1372_v20 = vmul.f32 %v2846_v15, %v3424_v24 }
 0x588   :  { %v2848_v33 = vpop.eup %2847 }
 0x589   :  { %v3466_v21 = vadd.f32 %v1373_v12, %v1372_v20 }
 0x58b   :  { %2849 = vtanh.f32 %v3466_v21 }
 0x595   :  { %v2850_v34 = vpop.eup %2849 }
 0x596   :  { %v1376_v39 = vmul.f32 %v2850_v34, %v2848_v33  ;;  %v1910_v34 = vld [vmem:[#allocation11 + $0x18] sm:$0xff] }
 0x598   :  { %1447 = vmatmul.mubr.f32.vlgmr.msra.gmra.mrb[10].mxu0 %v1376_v39  ;;  %1518 = vmatmul.mubr.f32.vlgmr.msra.gmra.mrb[10].mxu1 %v1376_v39 }
 0x599   :  { %2546 = vmatpush1.bf16.msra.mxu0 %v3137_v47  ;;  %2578 = vmatpush1.bf16.msra.mxu1 %v3140_v50 }
 0x59a   :  { %2548 = vmatprep.subr.bf16.mxu0 %v3143_v53  ;;  %2580 = vmatprep.subr.bf16.mxu1 %v3145_v56 }
 0x59b   :  { %1621 = vmatprep.mubr.f32.mxu0 %v3025_v0  ;;  %1692 = vmatprep.mubr.f32.mxu1 %v3025_v0 }
 0x59d   :  { %2550 = vmatpush1.bf16.msra.mxu0 %v3148_v60  ;;  %2582 = vmatpush1.bf16.msra.mxu1 %v3152_v63 }
 0x59e   :  { %2552 = vmatprep.subr.bf16.mxu0 %v3156_v3  ;;  %2584 = vmatprep.subr.bf16.mxu1 %v3159_v6 }
 0x5a1   :  { %2554 = vmatpush1.bf16.msra.mxu0 %v3162_v10  ;;  %2586 = vmatpush1.bf16.msra.mxu1 %v3166_v13 }
 0x5a2   :  { %2556 = vmatprep.subr.bf16.mxu0 %v3170_v16  ;;  %2588 = vmatprep.subr.bf16.mxu1 %v3173_v19 }
 0x5a5   :  { %2558 = vmatpush1.bf16.msra.mxu0 %v3176_v23  ;;  %2590 = vmatpush1.bf16.msra.mxu1 %v3180_v26 }
 0x5a6   :  { %2560 = vmatprep.subr.bf16.mxu0 %v3184_v29  ;;  %2592 = vmatprep.subr.bf16.mxu1 %v3187_v32 }
 0x5a9   :  { %2562 = vmatpush1.bf16.msra.mxu0 %v3190_v36  ;;  %2594 = vmatpush1.bf16.msra.mxu1 %v3194_v40 }
 0x5aa   :  { %2564 = vmatprep.subr.bf16.mxu0 %v3198_v44  ;;  %2596 = vmatprep.subr.bf16.mxu1 %v3201_v48 }
 0x5ad   :  { %2566 = vmatpush1.bf16.msra.mxu0 %v3204_v54  ;;  %2598 = vmatpush1.bf16.msra.mxu1 %v3208_v58 }
 0x5ae   :  { %2568 = vmatprep.subr.bf16.mxu0 %v3212_v62  ;;  %2600 = vmatprep.subr.bf16.mxu1 %v3215_v4 }
 0x5b1   :  { %2570 = vmatpush1.bf16.msra.mxu0 %v3218_v9  ;;  %2602 = vmatpush1.bf16.msra.mxu1 %v3222_v14 }
 0x5b2   :  { %2572 = vmatprep.subr.bf16.mxu0 %v3226_v18  ;;  %2604 = vmatprep.subr.bf16.mxu1 %v3229_v22 }
 0x5b5   :  { %2574 = vmatpush1.bf16.msra.mxu0 %v3232_v25  ;;  %2606 = vmatpush1.bf16.msra.mxu1 %v3236_v27 }
 0x5b6   :  { %2608 = vmatprep.subr.bf16.mxu0 %v3133_v38  ;;  %2640 = vmatprep.subr.bf16.mxu1 %v3135_v41 }
 0x66b   :  { %v1448_v24 = vpop.f32.mrb[10].mxu0  ;;  %v1519_v28 = vpop.f32.mrb[10].mxu1 }
 0x66c   :  { %v2705_v30 = vadd.f32 %v1448_v24, %v3286_v35  ;;  %v1450_v31 = vpop.f32.mrb[11].mxu0  ;;  %v1521_v42 = vpop.f32.mrb[11].mxu1  ;;  %v2721_v49 = vadd.f32 %v1519_v28, %v3292_v55  ;;  %v1911_v24 = vld [vmem:[#allocation11 + $0x20] sm:$0xff]  ;;  %v1912_v28 = vld [vmem:[#allocation11 + $0x28] sm:$0xff] }
 0x66d   :  { %v2706_v43 = vadd.f32 %v1450_v31, %v3288_v37  ;;  %v2722_v51 = vadd.f32 %v1521_v42, %v3295_v1  ;;  %v1913_v31 = vld [vmem:[#allocation11 + $0x30] sm:$0xff]  ;;  %v1914_v42 = vld [vmem:[#allocation11 + $0x38] sm:$0xff] }
 0x66e   :  { %v2033_v45 = vmul.f32 -1.442695, %v2705_v30  ;;  %v2035_v52 = vmul.f32 -1.442695, %v2721_v49  ;;  %v2678_v30 = vpack.c.bf16 %v1912_v28, %v1911_v24 }
 0x66f   :  { %v2034_v46 = vmul.f32 -1.442695, %v2706_v43  ;;  %v2681_v43 = vpack.c.bf16 %v1914_v42, %v1913_v31 }
 0x670   :  { %2851 = vpow2.f32 %v2033_v45  ;;  %v1915_v45 = vld [vmem:[#allocation11 + $0x40] sm:$0xff] }
 0x671   :  { %2853 = vpow2.f32 %v2034_v46  ;;  %v1916_v46 = vld [vmem:[#allocation11 + $0x48] sm:$0xff] }
 0x672   :  { %2855 = vtanh.f32 %v2722_v51  ;;  %v2684_v49 = vpack.c.bf16 %v1916_v46, %v1915_v45  ;;  %v1917_v51 = vld [vmem:[#allocation11 + $0x50] sm:$0xff] }
 0x673   :  { %2857 = vpow2.f32 %v2035_v52  ;;  %v1918_v52 = vld [vmem:[#allocation11 + $0x58] sm:$0xff] }
 0x67a   :  { %v2852_v38 = vpop.eup %2851 }
 0x67b   :  { %v1537_v57 = vadd.f32 1.0, %v2852_v38  ;;  %v2854_v41 = vpop.eup %2853  ;;  %v2687_v38 = vpack.c.bf16 %v1918_v52, %v1917_v51 }
 0x67c   :  { %v1538_v59 = vadd.f32 1.0, %v2854_v41  ;;  %v2856_v61 = vpop.eup %2855  ;;  %v1920_v41 = vld [vmem:[#allocation11 + $0x68] sm:$0xff] }
 0x67d   :  { %2859 = vrcp.f32 %v1537_v57  ;;  %v2858_v2 = vpop.eup %2857  ;;  %v1919_v57 = vld [vmem:[#allocation11 + $0x60] sm:$0xff] }
 0x67e   :  { %2861 = vrcp.f32 %v1538_v59  ;;  %v1539_v11 = vadd.f32 1.0, %v2858_v2  ;;  %v2690_v59 = vpack.c.bf16 %v1920_v41, %v1919_v57  ;;  %v1922_v2 = vld [vmem:[#allocation11 + $0x78] sm:$0xff] }
 0x680   :  { %2863 = vrcp.f32 %v1539_v11 }
 0x687   :  { %v2860_v5 = vpop.eup %2859 }
 0x688   :  { %v1548_v7 = vmul.f32 %v2860_v5, %v2856_v61  ;;  %v2862_v8 = vpop.eup %2861  ;;  %v1921_v61 = vld [vmem:[#allocation11 + $0x70] sm:$0xff] }
 0x689   :  { %v1547_v12 = vmul.f32 %v2862_v8, %v3466_v21  ;;  %v1909_v21 = vld [vmem:[#allocation11 + $0x10] sm:$0xff]  ;;  %v2693_v5 = vpack.c.bf16 %v1922_v2, %v1921_v61 }
 0x68a   :  { %v2864_v17 = vpop.eup %2863  ;;  %v2675_v39 = vpack.c.bf16 %v1910_v34, %v1909_v21 }
 0x68b   :  { %v3508_v15 = vadd.f32 %v1548_v7, %v1547_v12 }
 0x68d   :  { %2865 = vtanh.f32 %v3508_v15 }
 0x697   :  { %v2866_v20 = vpop.eup %2865 }
 0x698   :  { %v1551_v33 = vmul.f32 %v2866_v20, %v2864_v17 }
 0x69a   :  { %1622 = vmatmul.mubr.f32.vlgmr.msra.gmra.mrb[12].mxu0 %v1551_v33  ;;  %1693 = vmatmul.mubr.f32.vlgmr.msra.gmra.mrb[12].mxu1 %v1551_v33 }
 0x69b   :  { %2610 = vmatpush1.bf16.msra.mxu0 %v3137_v47  ;;  %2642 = vmatpush1.bf16.msra.mxu1 %v3140_v50 }
 0x69c   :  { %2612 = vmatprep.subr.bf16.mxu0 %v3143_v53  ;;  %2644 = vmatprep.subr.bf16.mxu1 %v3145_v56 }
 0x69d   :  { %1796 = vmatprep.mubr.f32.mxu0 %v3025_v0  ;;  %1867 = vmatprep.mubr.f32.mxu1 %v3025_v0 }
 0x69f   :  { %2614 = vmatpush1.bf16.msra.mxu0 %v3148_v60  ;;  %2646 = vmatpush1.bf16.msra.mxu1 %v3152_v63 }
 0x6a0   :  { %2616 = vmatprep.subr.bf16.mxu0 %v3156_v3  ;;  %2648 = vmatprep.subr.bf16.mxu1 %v3159_v6 }
 0x6a3   :  { %2618 = vmatpush1.bf16.msra.mxu0 %v3162_v10  ;;  %2650 = vmatpush1.bf16.msra.mxu1 %v3166_v13 }
 0x6a4   :  { %2620 = vmatprep.subr.bf16.mxu0 %v3170_v16  ;;  %2652 = vmatprep.subr.bf16.mxu1 %v3173_v19 }
 0x6a7   :  { %2622 = vmatpush1.bf16.msra.mxu0 %v3176_v23  ;;  %2654 = vmatpush1.bf16.msra.mxu1 %v3180_v26 }
 0x6a8   :  { %2624 = vmatprep.subr.bf16.mxu0 %v3184_v29  ;;  %2656 = vmatprep.subr.bf16.mxu1 %v3187_v32 }
 0x6ab   :  { %2626 = vmatpush1.bf16.msra.mxu0 %v3190_v36  ;;  %2658 = vmatpush1.bf16.msra.mxu1 %v3194_v40 }
 0x6ac   :  { %2628 = vmatprep.subr.bf16.mxu0 %v3198_v44  ;;  %2660 = vmatprep.subr.bf16.mxu1 %v3201_v48 }
 0x6af   :  { %2630 = vmatpush1.bf16.msra.mxu0 %v3204_v54  ;;  %2662 = vmatpush1.bf16.msra.mxu1 %v3208_v58 }
 0x6b0   :  { %2632 = vmatprep.subr.bf16.mxu0 %v3212_v62  ;;  %2664 = vmatprep.subr.bf16.mxu1 %v3215_v4 }
 0x6b3   :  { %2634 = vmatpush1.bf16.msra.mxu0 %v3218_v9  ;;  %2666 = vmatpush1.bf16.msra.mxu1 %v3222_v14 }
 0x6b4   :  { %2636 = vmatprep.subr.bf16.mxu0 %v3226_v18  ;;  %2668 = vmatprep.subr.bf16.mxu1 %v3229_v22  ;;  %v1907_v18 = vld [vmem:[#allocation11] sm:$0xff]  ;;  %v1908_v22 = vld [vmem:[#allocation11 + $0x8] sm:$0xff] }
 0x6b7   :  { %2638 = vmatpush1.bf16.msra.mxu0 %v3232_v25  ;;  %2670 = vmatpush1.bf16.msra.mxu1 %v3236_v27  ;;  %v2672_v25 = vpack.c.bf16 %v1908_v22, %v1907_v18  ;;  %v3026_v27 = vmov 0.0|0.0  }
 0x6b8   :  { %2671 = vmatprep.subr.bf16.mxu0 %v3026_v27 }
 0x76d   :  { %v1623_v47 = vpop.f32.mrb[12].mxu0  ;;  %v1694_v50 = vpop.f32.mrb[12].mxu1 }
 0x76e   :  { %v2707_v53 = vadd.f32 %v1623_v47, %v3286_v35  ;;  %v1625_v56 = vpop.f32.mrb[13].mxu0  ;;  %v1696_v60 = vpop.f32.mrb[13].mxu1  ;;  %v2723_v10 = vadd.f32 %v1694_v50, %v3292_v55 }
 0x76f   :  { %v2708_v63 = vadd.f32 %v1625_v56, %v3288_v37  ;;  %v2724_v13 = vadd.f32 %v1696_v60, %v3295_v1 }
 0x770   :  { %v2036_v3 = vmul.f32 -1.442695, %v2707_v53  ;;  %v2038_v16 = vmul.f32 -1.442695, %v2723_v10 }
 0x771   :  { %v2037_v6 = vmul.f32 -1.442695, %v2708_v63 }
 0x772   :  { %2867 = vpow2.f32 %v2036_v3 }
 0x773   :  { %2869 = vpow2.f32 %v2037_v6 }
 0x774   :  { %2871 = vtanh.f32 %v2724_v13 }
 0x775   :  { %2873 = vpow2.f32 %v2038_v16 }
 0x77c   :  { %v2868_v19 = vpop.eup %2867 }
 0x77d   :  { %v1712_v23 = vadd.f32 1.0, %v2868_v19  ;;  %v2870_v26 = vpop.eup %2869 }
 0x77e   :  { %v1713_v29 = vadd.f32 1.0, %v2870_v26  ;;  %v2872_v32 = vpop.eup %2871  ;;  %v2042_v26 = vld [vmem:[%s3577_s5] ss:$0 sm:$0xff] }
 0x77f   :  { %2875 = vrcp.f32 %v1712_v23  ;;  %v2874_v36 = vpop.eup %2873 }
 0x780   :  { %2877 = vrcp.f32 %v1713_v29  ;;  %v1714_v54 = vadd.f32 1.0, %v2874_v36 }
 0x782   :  { %2879 = vrcp.f32 %v1714_v54 }
 0x789   :  { %v2876_v40 = vpop.eup %2875 }
 0x78a   :  { %v1723_v44 = vmul.f32 %v2876_v40, %v2872_v32  ;;  %v2878_v48 = vpop.eup %2877 }
 0x78b   :  { %v1722_v58 = vmul.f32 %v2878_v48, %v3508_v15 }
 0x78c   :  { %v2880_v4 = vpop.eup %2879 }
 0x78d   :  { %v3548_v62 = vadd.f32 %v1723_v44, %v1722_v58 }
 0x78f   :  { %2881 = vtanh.f32 %v3548_v62 }
 0x799   :  { %v2882_v9 = vpop.eup %2881 }
 0x79a   :  { %v1726_v14 = vmul.f32 %v2882_v9, %v2880_v4 }
 0x79c   :  { %1797 = vmatmul.mubr.f32.vlgmr.msra.gmra.mrb[14].mxu0 %v1726_v14  ;;  %1868 = vmatmul.mubr.f32.vlgmr.msra.gmra.mrb[14].mxu1 %v1726_v14 }
 0x79d   :  { %2673 = vmatpush3.bf16.msra.mxu0 %v2672_v25  ;;  %2092 = vmatprep.mubr.msk.f32.mxu0 %vm3027_vm0, %v3025_v0 }
 0x79e   :  { %2674 = vmatprep.subr.bf16.mxu0 %v3026_v27 }
 0x7a1   :  { %2676 = vmatpush3.bf16.msra.mxu0 %v2675_v39 }
 0x7a2   :  { %2677 = vmatprep.subr.bf16.mxu0 %v3026_v27 }
 0x7a5   :  { %2679 = vmatpush3.bf16.msra.mxu0 %v2678_v30 }
 0x7a6   :  { %2680 = vmatprep.subr.bf16.mxu0 %v3026_v27 }
 0x7a9   :  { %2682 = vmatpush3.bf16.msra.mxu0 %v2681_v43 }
 0x7aa   :  { %2683 = vmatprep.subr.bf16.mxu0 %v3026_v27 }
 0x7ad   :  { %2685 = vmatpush3.bf16.msra.mxu0 %v2684_v49 }
 0x7ae   :  { %2686 = vmatprep.subr.bf16.mxu0 %v3026_v27 }
 0x7b1   :  { %2688 = vmatpush3.bf16.msra.mxu0 %v2687_v38 }
 0x7b2   :  { %2689 = vmatprep.subr.bf16.mxu0 %v3026_v27 }
 0x7b5   :  { %2691 = vmatpush3.bf16.msra.mxu0 %v2690_v59 }
 0x7b6   :  { %2692 = vmatprep.subr.bf16.mxu0 %v3026_v27 }
 0x7b9   :  { %2694 = vmatpush3.bf16.msra.mxu0 %v2693_v5 }
 0x86f   :  { %v1798_v7 = vpop.f32.mrb[14].mxu0  ;;  %v1869_v8 = vpop.f32.mrb[14].mxu1 }
 0x870   :  { %v2709_v11 = vadd.f32 %v1798_v7, %v3286_v35  ;;  %v1800_v12 = vpop.f32.mrb[15].mxu0  ;;  %v1871_v15 = vpop.f32.mrb[15].mxu1  ;;  %v2725_v0 = vadd.f32 %v1869_v8, %v3292_v55 }
 0x871   :  { %v2710_v17 = vadd.f32 %v1800_v12, %v3288_v37  ;;  %v2726_v47 = vadd.f32 %v1871_v15, %v3295_v1 }
 0x872   :  { %v2039_v20 = vmul.f32 -1.442695, %v2709_v11  ;;  %v2041_v50 = vmul.f32 -1.442695, %v2725_v0 }
 0x873   :  { %v2040_v33 = vmul.f32 -1.442695, %v2710_v17 }
 0x874   :  { %2883 = vpow2.f32 %v2039_v20 }
 0x875   :  { %2885 = vpow2.f32 %v2040_v33 }
 0x876   :  { %2887 = vtanh.f32 %v2726_v47 }
 0x877   :  { %2889 = vpow2.f32 %v2041_v50 }
 0x87e   :  { %v2884_v53 = vpop.eup %2883 }
 0x87f   :  { %v1887_v56 = vadd.f32 1.0, %v2884_v53  ;;  %v2886_v60 = vpop.eup %2885 }
 0x880   :  { %v1888_v35 = vadd.f32 1.0, %v2886_v60  ;;  %v2888_v63 = vpop.eup %2887 }
 0x881   :  { %2891 = vrcp.f32 %v1887_v56  ;;  %v2890_v3 = vpop.eup %2889 }
 0x882   :  { %2893 = vrcp.f32 %v1888_v35  ;;  %v1889_v13 = vadd.f32 1.0, %v2890_v3 }
 0x884   :  { %2895 = vrcp.f32 %v1889_v13 }
 0x88b   :  { %v2892_v37 = vpop.eup %2891 }
 0x88c   :  { %v1898_v6 = vmul.f32 %v2892_v37, %v2888_v63  ;;  %v2894_v10 = vpop.eup %2893 }
 0x88d   :  { %v1897_v16 = vmul.f32 %v2894_v10, %v3548_v62 }
 0x88e   :  { %v2896_v1 = vpop.eup %2895 }
 0x88f   :  { %v1899_v55 = vadd.f32 %v1898_v6, %v1897_v16 }
 0x891   :  { %2897 = vtanh.f32 %v1899_v55 }
 0x89b   :  { %v2898_v19 = vpop.eup %2897 }
 0x89c   :  { %v1901_v23 = vmul.f32 %v2898_v19, %v2896_v1 }
 0x89e   :  { %2093 = vmatmul.mubr.f32.vlgmr.msra.gmra.mrb[16].mxu0 %v1901_v23 }
 0x971   :  { %v1996_v29 = vpop.f32.mrb[16].mxu0 }
 0x972   :  { %v1997_v32 = vadd.f32 %v2042_v26, %v1996_v29  ;;  %v2094_v36 = vpop.f32.mrb[17].mxu0 }
 0x974   :  { %2000 = vst [vmem:[#allocation13] sm:$0xff] %v1997_v32 }
 0x975   :  { %2998 = shalt.err (!%p2995_p8)
}
 0x976   :  { %s2999_s28 = scalar_lea.hbm %s3578_s6, 128 }
 0x977   :  { %p3000_p9 = scmp.ne.s32.totalorder %s3578_s6, %s2999_s28  ;;  %p3003_p10 = scmp.lt.u32.totalorder %s2999_s28, %s3578_s6 }
 0x979   :  { %p3005_p11 = pnand %p3003_p10, %p3000_p9 }
 0x97b   :  { %3008 = shalt.err (!%p3005_p11)
}
 0x97c   :  { %2010 = dma.vmem_to_hbm [thread:$0]  %s2008_s24, 128, %s3578_s6, [#allocation7]  }
 0x97d   :  { %3015 = dma.done.wait [#allocation7], 128  }
 0x97e   :  { %3016 = vsyncadd [#allocation7], 4294967168 }
 0x97f   :  { %2014 = vsyncpa [#allocation6], 1 }
 0x980   :  { %2015 = vsyncpa [#allocation9], 1 }
 0x981   :  { %2016 = vsyncpa [#allocation12], 1 }
 0x982   :  { %2017 = vsyncpa [#allocation7], 1 }

</bundles_post_ra>
